<compile_context>
chip_gen: v7x
topology: tpu7x:2x2x1
jax: 0.10.0
libtpu: 0.0.40
codegen_flags: <defaults>
</compile_context>

<pallas_src>
import math
import functools

import jax
import jax.numpy as jnp
from jax.experimental import pallas as pl
from jax.experimental.pallas import tpu as pltpu


def _mha_kernel(q_ref, k_ref, v_ref, bias_ref, w_ref, out_ref, *, num_heads):
    # q_ref: (Bn, S, D)   k_ref/v_ref: (Bn, T, D)   bias_ref: (S, T) f32 additive
    # w_ref: (4, D, D) pre-transposed (y = x @ w)   out_ref: (Bn, S, D)
    Bn, S, D = q_ref.shape
    T = k_ref.shape[1]
    H = num_heads
    d = D // H
    scale = 1.0 / math.sqrt(d)
    in_dt = q_ref.dtype

    wq = w_ref[0]          # (D, D), already (D_in, D_out)
    wk = w_ref[1]
    wv = w_ref[2]
    wh = w_ref[3]

    # Fold the batch block into rows: the three projections become single large
    # MXU matmuls with contraction D (not d).
    q2 = q_ref[...].reshape(Bn * S, D)
    k2 = k_ref[...].reshape(Bn * T, D)
    v2 = v_ref[...].reshape(Bn * T, D)

    Q = jnp.dot(q2, wq, preferred_element_type=jnp.float32).astype(in_dt)   # (Bn*S, D)
    K = jnp.dot(k2, wk, preferred_element_type=jnp.float32).astype(in_dt)   # (Bn*T, D)
    V = jnp.dot(v2, wv, preferred_element_type=jnp.float32).astype(in_dt)   # (Bn*T, D)

    # Head split: lane slices + leading-axis stack -> (H*Bn, L, d).  Done once per
    # block; everything below is a single batched stream (no per-head unroll).
    def split_heads(x, L):
        x3 = x.reshape(Bn, L, D)
        heads = [x3[:, :, h * d:(h + 1) * d] for h in range(H)]
        return jnp.stack(heads, axis=0).reshape(H * Bn, L, d)

    Qh = split_heads(Q, S)                                                   # (H*Bn, S, d)
    Kh = split_heads(K, T)                                                   # (H*Bn, T, d)
    Vh = split_heads(V, T)                                                   # (H*Bn, T, d)

    bias = bias_ref[...]                                                     # (S, T) f32

    # Batched QK^T over all (head, batch) pairs at once (contracting d).
    logits = jnp.einsum("bsd,btd->bst", Qh, Kh,
                        preferred_element_type=jnp.float32) * scale          # (H*Bn, S, T)
    logits = logits + bias[None, :, :]

    # Numerically stable softmax in f32; reciprocal goes to the EUP slot (~free).
    m = jnp.max(logits, axis=-1, keepdims=True)
    e = jnp.exp(logits - m)
    s = jnp.sum(e, axis=-1, keepdims=True)
    p = (e * pl.reciprocal(s, approx=True)).astype(in_dt)
    # TODO(synk): dropout on attention scores is identity (eval-mode semantics).

    y = jnp.einsum("bst,btd->bsd", p, Vh,
                   preferred_element_type=jnp.float32).astype(in_dt)         # (H*Bn, S, d)

    # Head merge: re-assemble a lane-dense (Bn*S, D) slab in-register, then one
    # output-projection matmul and a single full-width store (no masked vst).
    y4 = y.reshape(H, Bn, S, d)
    y_merged = jnp.concatenate([y4[h] for h in range(H)], axis=-1)           # (Bn, S, D)
    out = jnp.dot(y_merged.reshape(Bn * S, D), wh,
                  preferred_element_type=jnp.float32)
    out_ref[...] = out.reshape(Bn, S, D).astype(out_ref.dtype)


def _vmem_caps():
    """Generation-aware VMEM sizing: (vmem_limit_bytes, block-choice budget)."""
    cap = None
    try:
        info = pltpu.get_tpu_info()
        cap = getattr(info, "vmem_capacity_bytes", None)
    except Exception:
        cap = None
    if not cap:
        cap = 64 * 1024 * 1024          # conservative fallback: v7x per-TC VMEM
    cap = int(cap)
    limit = min(int(cap * 0.85), 110 * 1024 * 1024)   # ~108 MiB v5e/v6e, ~54 MiB v7x
    limit = max(limit, 32 * 1024 * 1024)
    budget = int(cap * 0.70)                          # headroom for compiler scratch
    return limit, budget


def _choose_block_n(N, S, T, D, H, itemsize, vmem_budget):
    """Largest divisor of N that fits the VMEM budget; keeps the grid >= 2 steps
    (preferring an even length so v7x's two TensorCores split the batch axis)."""
    def est(bn):
        io = 2 * bn * (2 * S * D + 2 * T * D) * itemsize     # dbl-buffered q, out, k, v
        consts = 4 * D * D * itemsize + S * T * 4            # single-buffered weights + bias
        proj = bn * (S + 2 * T) * D * 4                      # f32 Q/K/V projections
        attn = 2 * bn * H * S * T * 4 + bn * S * D * 4       # f32 logits/probs + merged y
        return io + consts + proj + attn

    rows_target = 1024                                        # Bn*S rows feeding the MXU
    cap = max(1, min(N, max(1, rows_target // max(S, 1))))
    if N >= 2:
        cap = min(cap, N // 2)                                # keep >= 2 grid steps
    fits = [bn for bn in range(cap, 0, -1) if N % bn == 0 and est(bn) <= vmem_budget]
    if not fits:
        return 1
    for bn in fits:                                           # prefer even grid length
        if (N // bn) % 2 == 0:
            return bn
    return fits[0]


def multi_head_attention(query, key, value, wq, wk, wv, wh, attn_mask=None,
                         *, num_heads, block_n=None):
    N, S, D = query.shape
    _, T, _ = value.shape
    assert key.shape == value.shape
    assert D % num_heads == 0
    in_dt = query.dtype

    # Additive mask bias, hoisted into the wrapper (finite bias avoids the
    # fully-masked-row NaN of masked_fill(-inf)).
    if attn_mask is None:
        bias = jnp.zeros((S, T), dtype=jnp.float32)
    else:
        bias = jnp.where(attn_mask == 0, jnp.float32(-1e30), jnp.float32(0.0))

    # nn.Linear stores (D_out, D_in); pre-transpose once to (D_in, D_out), stack into
    # one weight slab, match the activation dtype so all MXU operands share one dtype.
    w = jnp.stack([wq.T, wk.T, wv.T, wh.T]).astype(in_dt)                    # (4, D, D)

    vmem_limit, vmem_budget = _vmem_caps()
    if block_n is None:
        block_n = _choose_block_n(N, S, T, D, num_heads,
                                  jnp.dtype(in_dt).itemsize, vmem_budget)
    assert N % block_n == 0, "block_n must divide the batch size"

    kernel = functools.partial(_mha_kernel, num_heads=num_heads)

    def run(single_buffer_consts):
        if single_buffer_consts:
            def const_spec(shape, imap):
                return pl.BlockSpec(shape, imap, pipeline_mode=pl.Buffered(1))
        else:
            def const_spec(shape, imap):
                return pl.BlockSpec(shape, imap)

        return pl.pallas_call(
            kernel,
            out_shape=jax.ShapeDtypeStruct((N, S, D), in_dt),
            grid_spec=pltpu.PrefetchScalarGridSpec(
                num_scalar_prefetch=0,
                grid=(N // block_n,),
                in_specs=[
                    pl.BlockSpec((block_n, S, D), lambda n: (n, 0, 0)),   # query
                    pl.BlockSpec((block_n, T, D), lambda n: (n, 0, 0)),   # key
                    pl.BlockSpec((block_n, T, D), lambda n: (n, 0, 0)),   # value
                    const_spec((S, T), lambda n: (0, 0)),                 # additive mask bias
                    const_spec((4, D, D), lambda n: (0, 0, 0)),           # stacked Wq/Wk/Wv/Wh
                ],
                out_specs=pl.BlockSpec((block_n, S, D), lambda n: (n, 0, 0)),
            ),
            compiler_params=pltpu.CompilerParams(
                dimension_semantics=("parallel",),
                vmem_limit_bytes=vmem_limit,
            ),
        )(query, key, value, bias, w)

    try:
        return run(True)
    except Exception:
        # TODO(synk): drop this fallback once pl.Buffered(1) single-buffering of the
        # grid-constant weight/bias blocks is confirmed on every target jax version.
        return run(False)


def _reference(query, key, value, wq, wk, wv, wh, attn_mask, num_heads):
    # pure-JAX reference mirroring the PyTorch forward (eval mode)
    N, S, D = query.shape
    _, T, _ = value.shape
    H = num_heads
    d = D // H
    Q = (query @ wq.T).reshape(N, S, H, d).transpose(0, 2, 1, 3)
    K = (key @ wk.T).reshape(N, T, H, d).transpose(0, 2, 1, 3)
    V = (value @ wv.T).reshape(N, T, H, d).transpose(0, 2, 1, 3)
    logits = jnp.einsum("nhsd,nhtd->nhst", Q, K) / math.sqrt(d)
    if attn_mask is not None:
        logits = jnp.where(attn_mask == 0, -jnp.inf, logits)
    scores = jax.nn.softmax(logits, axis=-1)
    y = jnp.einsum("nhst,nhtd->nhsd", scores, V)
    y = y.transpose(0, 2, 1, 3).reshape(N, S, D)
    return y @ wh.T


if __name__ == "__main__":
    N, S, T, D, H = 4, 8, 8, 32, 4

    key0 = jax.random.PRNGKey(0)
    kq, kk, kv, k_wq, k_wk, k_wv, k_wh = jax.random.split(key0, 7)

    query = jax.random.normal(kq, (N, S, D), dtype=jnp.float32)
    keyx = jax.random.normal(kk, (N, T, D), dtype=jnp.float32)
    value = jax.random.normal(kv, (N, T, D), dtype=jnp.float32)

    # deterministic nn.Linear-style weights (D_out, D_in), no bias
    scale = 1.0 / math.sqrt(D)
    wq = jax.random.uniform(k_wq, (D, D), minval=-scale, maxval=scale, dtype=jnp.float32)
    wk = jax.random.uniform(k_wk, (D, D), minval=-scale, maxval=scale, dtype=jnp.float32)
    wv = jax.random.uniform(k_wv, (D, D), minval=-scale, maxval=scale, dtype=jnp.float32)
    wh = jax.random.uniform(k_wh, (D, D), minval=-scale, maxval=scale, dtype=jnp.float32)

    # causal-style mask (1 = keep, 0 = mask), broadcast over batch & heads
    attn_mask = jnp.tril(jnp.ones((S, T), dtype=jnp.float32))

    out = multi_head_attention(query, keyx, value, wq, wk, wv, wh,
                               attn_mask=attn_mask, num_heads=H)
    out = jax.block_until_ready(out)

    ref = _reference(query, keyx, value, wq, wk, wv, wh, attn_mask, H)
    assert out.shape == (N, S, D)
    # tolerance covers the approx (EUP) reciprocal in the softmax denominator
    assert jnp.allclose(out, ref, atol=1e-2, rtol=1e-2), "mismatch vs reference"

    print("KERNEL_OK")
</pallas_src>

<mosaic_0001>
module attributes {stable_mosaic.version = 11 : i64} {
  func.func @_mha_kernel(%arg0: i32, %arg1: memref<2x8x32xf32, #tpu.memory_space<vmem>>, %arg2: memref<2x8x32xf32, #tpu.memory_space<vmem>>, %arg3: memref<2x8x32xf32, #tpu.memory_space<vmem>>, %arg4: memref<8x8xf32, #tpu.memory_space<vmem>>, %arg5: memref<4x32x32xf32, #tpu.memory_space<vmem>>, %arg6: memref<2x8x32xf32, #tpu.memory_space<vmem>>) attributes {dimension_semantics = [#tpu.dimension_semantics<parallel>], iteration_bounds = array<i64: 2>, scalar_prefetch = 0 : i64, scratch_operands = 0 : i64, tpu.core_type = #tpu.core_type<tc>, window_params = [{transform_indices = @transform_0, window_bounds = array<i64: 2, 8, 32>}, {transform_indices = @transform_1, window_bounds = array<i64: 2, 8, 32>}, {transform_indices = @transform_2, window_bounds = array<i64: 2, 8, 32>}, {pipeline_mode = #tpu.pipeline_mode<synchronous>, transform_indices = @transform_3, window_bounds = array<i64: 8, 8>}, {pipeline_mode = #tpu.pipeline_mode<synchronous>, transform_indices = @transform_4, window_bounds = array<i64: 4, 32, 32>}, {transform_indices = @transform_5, window_bounds = array<i64: 2, 8, 32>}]} {
    %c0 = arith.constant 0 : index
    %c0_0 = arith.constant 0 : index
    %c0_1 = arith.constant 0 : index
    %0 = vector.load %arg5[%c0, %c0_0, %c0_1] : memref<4x32x32xf32, #tpu.memory_space<vmem>>, vector<1x32x32xf32>
    %1 = vector.shape_cast %0 : vector<1x32x32xf32> to vector<32x32xf32>
    %c1 = arith.constant 1 : index
    %c0_2 = arith.constant 0 : index
    %c0_3 = arith.constant 0 : index
    %2 = vector.load %arg5[%c1, %c0_2, %c0_3] : memref<4x32x32xf32, #tpu.memory_space<vmem>>, vector<1x32x32xf32>
    %3 = vector.shape_cast %2 : vector<1x32x32xf32> to vector<32x32xf32>
    %c2 = arith.constant 2 : index
    %c0_4 = arith.constant 0 : index
    %c0_5 = arith.constant 0 : index
    %4 = vector.load %arg5[%c2, %c0_4, %c0_5] : memref<4x32x32xf32, #tpu.memory_space<vmem>>, vector<1x32x32xf32>
    %5 = vector.shape_cast %4 : vector<1x32x32xf32> to vector<32x32xf32>
    %c3 = arith.constant 3 : index
    %c0_6 = arith.constant 0 : index
    %c0_7 = arith.constant 0 : index
    %6 = vector.load %arg5[%c3, %c0_6, %c0_7] : memref<4x32x32xf32, #tpu.memory_space<vmem>>, vector<1x32x32xf32>
    %7 = vector.shape_cast %6 : vector<1x32x32xf32> to vector<32x32xf32>
    %c0_8 = arith.constant 0 : index
    %c0_9 = arith.constant 0 : index
    %c0_10 = arith.constant 0 : index
    %8 = vector.load %arg1[%c0_8, %c0_9, %c0_10] : memref<2x8x32xf32, #tpu.memory_space<vmem>>, vector<2x8x32xf32>
    %9 = vector.shape_cast %8 : vector<2x8x32xf32> to vector<16x32xf32>
    %c0_11 = arith.constant 0 : index
    %c0_12 = arith.constant 0 : index
    %c0_13 = arith.constant 0 : index
    %10 = vector.load %arg2[%c0_11, %c0_12, %c0_13] : memref<2x8x32xf32, #tpu.memory_space<vmem>>, vector<2x8x32xf32>
    %11 = vector.shape_cast %10 : vector<2x8x32xf32> to vector<16x32xf32>
    %c0_14 = arith.constant 0 : index
    %c0_15 = arith.constant 0 : index
    %c0_16 = arith.constant 0 : index
    %12 = vector.load %arg3[%c0_14, %c0_15, %c0_16] : memref<2x8x32xf32, #tpu.memory_space<vmem>>, vector<2x8x32xf32>
    %13 = vector.shape_cast %12 : vector<2x8x32xf32> to vector<16x32xf32>
    %cst = arith.constant dense<0.000000e+00> : vector<16x32xf32>
    %14 = tpu.matmul %9, %1, %cst {dimension_numbers = #tpu.dot_dimension_numbers<[1], [0], [0], [1], [0, 0, 1, 1], [], []>} : vector<16x32xf32>, vector<32x32xf32>, vector<16x32xf32> -> vector<16x32xf32>
    %cst_17 = arith.constant dense<0.000000e+00> : vector<16x32xf32>
    %15 = tpu.matmul %11, %3, %cst_17 {dimension_numbers = #tpu.dot_dimension_numbers<[1], [0], [0], [1], [0, 0, 1, 1], [], []>} : vector<16x32xf32>, vector<32x32xf32>, vector<16x32xf32> -> vector<16x32xf32>
    %cst_18 = arith.constant dense<0.000000e+00> : vector<16x32xf32>
    %16 = tpu.matmul %13, %5, %cst_18 {dimension_numbers = #tpu.dot_dimension_numbers<[1], [0], [0], [1], [0, 0, 1, 1], [], []>} : vector<16x32xf32>, vector<32x32xf32>, vector<16x32xf32> -> vector<16x32xf32>
    %17 = vector.shape_cast %14 : vector<16x32xf32> to vector<2x8x32xf32>
    %18 = vector.extract_strided_slice %17 {offsets = [0, 0, 0], sizes = [2, 8, 8], strides = [1, 1, 1]} : vector<2x8x32xf32> to vector<2x8x8xf32>
    %19 = vector.extract_strided_slice %17 {offsets = [0, 0, 8], sizes = [2, 8, 8], strides = [1, 1, 1]} : vector<2x8x32xf32> to vector<2x8x8xf32>
    %20 = vector.extract_strided_slice %17 {offsets = [0, 0, 16], sizes = [2, 8, 8], strides = [1, 1, 1]} : vector<2x8x32xf32> to vector<2x8x8xf32>
    %21 = vector.extract_strided_slice %17 {offsets = [0, 0, 24], sizes = [2, 8, 8], strides = [1, 1, 1]} : vector<2x8x32xf32> to vector<2x8x8xf32>
    %22 = vector.shape_cast %18 : vector<2x8x8xf32> to vector<1x2x8x8xf32>
    %23 = vector.shape_cast %19 : vector<2x8x8xf32> to vector<1x2x8x8xf32>
    %24 = vector.shape_cast %20 : vector<2x8x8xf32> to vector<1x2x8x8xf32>
    %25 = vector.shape_cast %21 : vector<2x8x8xf32> to vector<1x2x8x8xf32>
    %26 = tpu.concatenate %22, %23, %24, %25 in 0 : vector<1x2x8x8xf32>, vector<1x2x8x8xf32>, vector<1x2x8x8xf32>, vector<1x2x8x8xf32> -> vector<4x2x8x8xf32>
    %27 = vector.shape_cast %26 : vector<4x2x8x8xf32> to vector<8x8x8xf32>
    %28 = vector.shape_cast %15 : vector<16x32xf32> to vector<2x8x32xf32>
    %29 = vector.extract_strided_slice %28 {offsets = [0, 0, 0], sizes = [2, 8, 8], strides = [1, 1, 1]} : vector<2x8x32xf32> to vector<2x8x8xf32>
    %30 = vector.extract_strided_slice %28 {offsets = [0, 0, 8], sizes = [2, 8, 8], strides = [1, 1, 1]} : vector<2x8x32xf32> to vector<2x8x8xf32>
    %31 = vector.extract_strided_slice %28 {offsets = [0, 0, 16], sizes = [2, 8, 8], strides = [1, 1, 1]} : vector<2x8x32xf32> to vector<2x8x8xf32>
    %32 = vector.extract_strided_slice %28 {offsets = [0, 0, 24], sizes = [2, 8, 8], strides = [1, 1, 1]} : vector<2x8x32xf32> to vector<2x8x8xf32>
    %33 = vector.shape_cast %29 : vector<2x8x8xf32> to vector<1x2x8x8xf32>
    %34 = vector.shape_cast %30 : vector<2x8x8xf32> to vector<1x2x8x8xf32>
    %35 = vector.shape_cast %31 : vector<2x8x8xf32> to vector<1x2x8x8xf32>
    %36 = vector.shape_cast %32 : vector<2x8x8xf32> to vector<1x2x8x8xf32>
    %37 = tpu.concatenate %33, %34, %35, %36 in 0 : vector<1x2x8x8xf32>, vector<1x2x8x8xf32>, vector<1x2x8x8xf32>, vector<1x2x8x8xf32> -> vector<4x2x8x8xf32>
    %38 = vector.shape_cast %37 : vector<4x2x8x8xf32> to vector<8x8x8xf32>
    %39 = vector.shape_cast %16 : vector<16x32xf32> to vector<2x8x32xf32>
    %40 = vector.extract_strided_slice %39 {offsets = [0, 0, 0], sizes = [2, 8, 8], strides = [1, 1, 1]} : vector<2x8x32xf32> to vector<2x8x8xf32>
    %41 = vector.extract_strided_slice %39 {offsets = [0, 0, 8], sizes = [2, 8, 8], strides = [1, 1, 1]} : vector<2x8x32xf32> to vector<2x8x8xf32>
    %42 = vector.extract_strided_slice %39 {offsets = [0, 0, 16], sizes = [2, 8, 8], strides = [1, 1, 1]} : vector<2x8x32xf32> to vector<2x8x8xf32>
    %43 = vector.extract_strided_slice %39 {offsets = [0, 0, 24], sizes = [2, 8, 8], strides = [1, 1, 1]} : vector<2x8x32xf32> to vector<2x8x8xf32>
    %44 = vector.shape_cast %40 : vector<2x8x8xf32> to vector<1x2x8x8xf32>
    %45 = vector.shape_cast %41 : vector<2x8x8xf32> to vector<1x2x8x8xf32>
    %46 = vector.shape_cast %42 : vector<2x8x8xf32> to vector<1x2x8x8xf32>
    %47 = vector.shape_cast %43 : vector<2x8x8xf32> to vector<1x2x8x8xf32>
    %48 = tpu.concatenate %44, %45, %46, %47 in 0 : vector<1x2x8x8xf32>, vector<1x2x8x8xf32>, vector<1x2x8x8xf32>, vector<1x2x8x8xf32> -> vector<4x2x8x8xf32>
    %49 = vector.shape_cast %48 : vector<4x2x8x8xf32> to vector<8x8x8xf32>
    %c0_19 = arith.constant 0 : index
    %c0_20 = arith.constant 0 : index
    %50 = vector.load %arg4[%c0_19, %c0_20] : memref<8x8xf32, #tpu.memory_space<vmem>>, vector<8x8xf32>
    "tpu.trace_start"() <{level = 10 : i32, message = "bsd,btd->bst"}> : () -> ()
    %cst_21 = arith.constant dense<0.000000e+00> : vector<8x8x8xf32>
    %51 = tpu.matmul %27, %38, %cst_21 {dimension_numbers = #tpu.dot_dimension_numbers<[2], [2], [1], [1], [0, 0, 0, 1, 1, 1], [0], [0]>} : vector<8x8x8xf32>, vector<8x8x8xf32>, vector<8x8x8xf32> -> vector<8x8x8xf32>
    "tpu.trace_stop"() : () -> ()
    %cst_22 = arith.constant 0.353553385 : f32
    %52 = vector.broadcast %cst_22 : f32 to vector<8x8x8xf32>
    %53 = arith.mulf %51, %52 : vector<8x8x8xf32>
    %54 = vector.shape_cast %50 : vector<8x8xf32> to vector<1x8x8xf32>
    %55 = vector.broadcast %54 : vector<1x8x8xf32> to vector<8x8x8xf32>
    %56 = arith.addf %53, %55 : vector<8x8x8xf32>
    %cst_23 = arith.constant dense<0xFF800000> : vector<8x8xf32>
    %57 = vector.multi_reduction <maximumf>, %56, %cst_23 [2] : vector<8x8x8xf32> to vector<8x8xf32>
    %58 = vector.shape_cast %57 : vector<8x8xf32> to vector<8x8x1xf32>
    %59 = vector.broadcast %58 : vector<8x8x1xf32> to vector<8x8x8xf32>
    %60 = arith.subf %56, %59 : vector<8x8x8xf32>
    %61 = math.exp %60 : vector<8x8x8xf32>
    %cst_24 = arith.constant dense<0.000000e+00> : vector<8x8xf32>
    %62 = vector.multi_reduction <add>, %61, %cst_24 [2] : vector<8x8x8xf32> to vector<8x8xf32>
    %63 = vector.shape_cast %62 : vector<8x8xf32> to vector<8x8x1xf32>
    %64 = tpu.reciprocal %63 {approx = true} : vector<8x8x1xf32> -> vector<8x8x1xf32>
    %65 = vector.broadcast %64 : vector<8x8x1xf32> to vector<8x8x8xf32>
    %66 = arith.mulf %61, %65 : vector<8x8x8xf32>
    "tpu.trace_start"() <{level = 10 : i32, message = "bst,btd->bsd"}> : () -> ()
    %cst_25 = arith.constant dense<0.000000e+00> : vector<8x8x8xf32>
    %67 = tpu.matmul %66, %49, %cst_25 {dimension_numbers = #tpu.dot_dimension_numbers<[2], [1], [1], [2], [0, 0, 0, 1, 1, 2], [0], [0]>} : vector<8x8x8xf32>, vector<8x8x8xf32>, vector<8x8x8xf32> -> vector<8x8x8xf32>
    "tpu.trace_stop"() : () -> ()
    %68 = vector.shape_cast %67 : vector<8x8x8xf32> to vector<4x2x8x8xf32>
    %69 = vector.extract_strided_slice %68 {offsets = [0, 0, 0, 0], sizes = [1, 2, 8, 8], strides = [1, 1, 1, 1]} : vector<4x2x8x8xf32> to vector<1x2x8x8xf32>
    %70 = vector.shape_cast %69 : vector<1x2x8x8xf32> to vector<2x8x8xf32>
    %71 = vector.extract_strided_slice %68 {offsets = [1, 0, 0, 0], sizes = [1, 2, 8, 8], strides = [1, 1, 1, 1]} : vector<4x2x8x8xf32> to vector<1x2x8x8xf32>
    %72 = vector.shape_cast %71 : vector<1x2x8x8xf32> to vector<2x8x8xf32>
    %73 = vector.extract_strided_slice %68 {offsets = [2, 0, 0, 0], sizes = [1, 2, 8, 8], strides = [1, 1, 1, 1]} : vector<4x2x8x8xf32> to vector<1x2x8x8xf32>
    %74 = vector.shape_cast %73 : vector<1x2x8x8xf32> to vector<2x8x8xf32>
    %75 = vector.extract_strided_slice %68 {offsets = [3, 0, 0, 0], sizes = [1, 2, 8, 8], strides = [1, 1, 1, 1]} : vector<4x2x8x8xf32> to vector<1x2x8x8xf32>
    %76 = vector.shape_cast %75 : vector<1x2x8x8xf32> to vector<2x8x8xf32>
    %77 = tpu.concatenate %70, %72, %74, %76 in 2 : vector<2x8x8xf32>, vector<2x8x8xf32>, vector<2x8x8xf32>, vector<2x8x8xf32> -> vector<2x8x32xf32>
    %78 = vector.shape_cast %77 : vector<2x8x32xf32> to vector<16x32xf32>
    %cst_26 = arith.constant dense<0.000000e+00> : vector<16x32xf32>
    %79 = tpu.matmul %78, %7, %cst_26 {dimension_numbers = #tpu.dot_dimension_numbers<[1], [0], [0], [1], [0, 0, 1, 1], [], []>} : vector<16x32xf32>, vector<32x32xf32>, vector<16x32xf32> -> vector<16x32xf32>
    %80 = vector.shape_cast %79 : vector<16x32xf32> to vector<2x8x32xf32>
    %c0_27 = arith.constant 0 : index
    %c0_28 = arith.constant 0 : index
    %c0_29 = arith.constant 0 : index
    %81 = vector.load %arg6[%c0_27, %c0_28, %c0_29] : memref<2x8x32xf32, #tpu.memory_space<vmem>>, vector<2x8x32xf32>
    tpu.vector_store %arg6[%c0_27, %c0_28, %c0_29], %80 {strides = array<i32>} : memref<2x8x32xf32, #tpu.memory_space<vmem>>, vector<2x8x32xf32>,
    return
  }
  func.func @transform_0(%arg0: i32) -> (i32, i32, i32) {
    %c0_i32 = arith.constant 0 : i32
    %c0_i32_0 = arith.constant 0 : i32
    %c0_i32_1 = arith.constant 0 : i32
    return %arg0, %c0_i32, %c0_i32_0 : i32, i32, i32
  }
  func.func @transform_1(%arg0: i32) -> (i32, i32, i32) {
    %c0_i32 = arith.constant 0 : i32
    %c0_i32_0 = arith.constant 0 : i32
    %c0_i32_1 = arith.constant 0 : i32
    return %arg0, %c0_i32, %c0_i32_0 : i32, i32, i32
  }
  func.func @transform_2(%arg0: i32) -> (i32, i32, i32) {
    %c0_i32 = arith.constant 0 : i32
    %c0_i32_0 = arith.constant 0 : i32
    %c0_i32_1 = arith.constant 0 : i32
    return %arg0, %c0_i32, %c0_i32_0 : i32, i32, i32
  }
  func.func @transform_3(%arg0: i32) -> (i32, i32) {
    %c0_i32 = arith.constant 0 : i32
    %c0_i32_0 = arith.constant 0 : i32
    %c0_i32_1 = arith.constant 0 : i32
    return %c0_i32, %c0_i32_0 : i32, i32
  }
  func.func @transform_4(%arg0: i32) -> (i32, i32, i32) {
    %c0_i32 = arith.constant 0 : i32
    %c0_i32_0 = arith.constant 0 : i32
    %c0_i32_1 = arith.constant 0 : i32
    %c0_i32_2 = arith.constant 0 : i32
    return %c0_i32, %c0_i32_0, %c0_i32_1 : i32, i32, i32
  }
  func.func @transform_5(%arg0: i32) -> (i32, i32, i32) {
    %c0_i32 = arith.constant 0 : i32
    %c0_i32_0 = arith.constant 0 : i32
    %c0_i32_1 = arith.constant 0 : i32
    return %arg0, %c0_i32, %c0_i32_0 : i32, i32, i32
  }
}

module attributes {stable_mosaic.version = 11 : i64} {
  func.func @_mha_kernel(%arg0: i32, %arg1: memref<2x8x32xf32, #tpu.memory_space<vmem>>, %arg2: memref<2x8x32xf32, #tpu.memory_space<vmem>>, %arg3: memref<2x8x32xf32, #tpu.memory_space<vmem>>, %arg4: memref<8x8xf32, #tpu.memory_space<vmem>>, %arg5: memref<4x32x32xf32, #tpu.memory_space<vmem>>, %arg6: memref<2x8x32xf32, #tpu.memory_space<vmem>>) attributes {dimension_semantics = [#tpu.dimension_semantics<parallel>], iteration_bounds = array<i64: 2>, scalar_prefetch = 0 : i64, scratch_operands = 0 : i64, tpu.core_type = #tpu.core_type<tc>, window_params = [{transform_indices = @transform_0, window_bounds = array<i64: 2, 8, 32>}, {transform_indices = @transform_1, window_bounds = array<i64: 2, 8, 32>}, {transform_indices = @transform_2, window_bounds = array<i64: 2, 8, 32>}, {pipeline_mode = #tpu.pipeline_mode<synchronous>, transform_indices = @transform_3, window_bounds = array<i64: 8, 8>}, {pipeline_mode = #tpu.pipeline_mode<synchronous>, transform_indices = @transform_4, window_bounds = array<i64: 4, 32, 32>}, {transform_indices = @transform_5, window_bounds = array<i64: 2, 8, 32>}]} {
    %c0 = arith.constant 0 : index
    %c0_0 = arith.constant 0 : index
    %c0_1 = arith.constant 0 : index
    %0 = vector.load %arg5[%c0, %c0_0, %c0_1] : memref<4x32x32xf32, #tpu.memory_space<vmem>>, vector<1x32x32xf32>
    %1 = vector.shape_cast %0 : vector<1x32x32xf32> to vector<32x32xf32>
    %c1 = arith.constant 1 : index
    %c0_2 = arith.constant 0 : index
    %c0_3 = arith.constant 0 : index
    %2 = vector.load %arg5[%c1, %c0_2, %c0_3] : memref<4x32x32xf32, #tpu.memory_space<vmem>>, vector<1x32x32xf32>
    %3 = vector.shape_cast %2 : vector<1x32x32xf32> to vector<32x32xf32>
    %c2 = arith.constant 2 : index
    %c0_4 = arith.constant 0 : index
    %c0_5 = arith.constant 0 : index
    %4 = vector.load %arg5[%c2, %c0_4, %c0_5] : memref<4x32x32xf32, #tpu.memory_space<vmem>>, vector<1x32x32xf32>
    %5 = vector.shape_cast %4 : vector<1x32x32xf32> to vector<32x32xf32>
    %c3 = arith.constant 3 : index
    %c0_6 = arith.constant 0 : index
    %c0_7 = arith.constant 0 : index
    %6 = vector.load %arg5[%c3, %c0_6, %c0_7] : memref<4x32x32xf32, #tpu.memory_space<vmem>>, vector<1x32x32xf32>
    %7 = vector.shape_cast %6 : vector<1x32x32xf32> to vector<32x32xf32>
    %c0_8 = arith.constant 0 : index
    %c0_9 = arith.constant 0 : index
    %c0_10 = arith.constant 0 : index
    %8 = vector.load %arg1[%c0_8, %c0_9, %c0_10] : memref<2x8x32xf32, #tpu.memory_space<vmem>>, vector<2x8x32xf32>
    %9 = vector.shape_cast %8 : vector<2x8x32xf32> to vector<16x32xf32>
    %c0_11 = arith.constant 0 : index
    %c0_12 = arith.constant 0 : index
    %c0_13 = arith.constant 0 : index
    %10 = vector.load %arg2[%c0_11, %c0_12, %c0_13] : memref<2x8x32xf32, #tpu.memory_space<vmem>>, vector<2x8x32xf32>
    %11 = vector.shape_cast %10 : vector<2x8x32xf32> to vector<16x32xf32>
    %c0_14 = arith.constant 0 : index
    %c0_15 = arith.constant 0 : index
    %c0_16 = arith.constant 0 : index
    %12 = vector.load %arg3[%c0_14, %c0_15, %c0_16] : memref<2x8x32xf32, #tpu.memory_space<vmem>>, vector<2x8x32xf32>
    %13 = vector.shape_cast %12 : vector<2x8x32xf32> to vector<16x32xf32>
    %cst = arith.constant dense<0.000000e+00> : vector<16x32xf32>
    %14 = tpu.matmul %9, %1, %cst {dimension_numbers = #tpu.dot_dimension_numbers<[1], [0], [0], [1], [0, 0, 1, 1], [], []>} : vector<16x32xf32>, vector<32x32xf32>, vector<16x32xf32> -> vector<16x32xf32>
    %cst_17 = arith.constant dense<0.000000e+00> : vector<16x32xf32>
    %15 = tpu.matmul %11, %3, %cst_17 {dimension_numbers = #tpu.dot_dimension_numbers<[1], [0], [0], [1], [0, 0, 1, 1], [], []>} : vector<16x32xf32>, vector<32x32xf32>, vector<16x32xf32> -> vector<16x32xf32>
    %cst_18 = arith.constant dense<0.000000e+00> : vector<16x32xf32>
    %16 = tpu.matmul %13, %5, %cst_18 {dimension_numbers = #tpu.dot_dimension_numbers<[1], [0], [0], [1], [0, 0, 1, 1], [], []>} : vector<16x32xf32>, vector<32x32xf32>, vector<16x32xf32> -> vector<16x32xf32>
    %17 = vector.shape_cast %14 : vector<16x32xf32> to vector<2x8x32xf32>
    %18 = vector.extract_strided_slice %17 {offsets = [0, 0, 0], sizes = [2, 8, 8], strides = [1, 1, 1]} : vector<2x8x32xf32> to vector<2x8x8xf32>
    %19 = vector.extract_strided_slice %17 {offsets = [0, 0, 8], sizes = [2, 8, 8], strides = [1, 1, 1]} : vector<2x8x32xf32> to vector<2x8x8xf32>
    %20 = vector.extract_strided_slice %17 {offsets = [0, 0, 16], sizes = [2, 8, 8], strides = [1, 1, 1]} : vector<2x8x32xf32> to vector<2x8x8xf32>
    %21 = vector.extract_strided_slice %17 {offsets = [0, 0, 24], sizes = [2, 8, 8], strides = [1, 1, 1]} : vector<2x8x32xf32> to vector<2x8x8xf32>
    %22 = vector.shape_cast %18 : vector<2x8x8xf32> to vector<1x2x8x8xf32>
    %23 = vector.shape_cast %19 : vector<2x8x8xf32> to vector<1x2x8x8xf32>
    %24 = vector.shape_cast %20 : vector<2x8x8xf32> to vector<1x2x8x8xf32>
    %25 = vector.shape_cast %21 : vector<2x8x8xf32> to vector<1x2x8x8xf32>
    %26 = tpu.concatenate %22, %23, %24, %25 in 0 : vector<1x2x8x8xf32>, vector<1x2x8x8xf32>, vector<1x2x8x8xf32>, vector<1x2x8x8xf32> -> vector<4x2x8x8xf32>
    %27 = vector.shape_cast %26 : vector<4x2x8x8xf32> to vector<8x8x8xf32>
    %28 = vector.shape_cast %15 : vector<16x32xf32> to vector<2x8x32xf32>
    %29 = vector.extract_strided_slice %28 {offsets = [0, 0, 0], sizes = [2, 8, 8], strides = [1, 1, 1]} : vector<2x8x32xf32> to vector<2x8x8xf32>
    %30 = vector.extract_strided_slice %28 {offsets = [0, 0, 8], sizes = [2, 8, 8], strides = [1, 1, 1]} : vector<2x8x32xf32> to vector<2x8x8xf32>
    %31 = vector.extract_strided_slice %28 {offsets = [0, 0, 16], sizes = [2, 8, 8], strides = [1, 1, 1]} : vector<2x8x32xf32> to vector<2x8x8xf32>
    %32 = vector.extract_strided_slice %28 {offsets = [0, 0, 24], sizes = [2, 8, 8], strides = [1, 1, 1]} : vector<2x8x32xf32> to vector<2x8x8xf32>
    %33 = vector.shape_cast %29 : vector<2x8x8xf32> to vector<1x2x8x8xf32>
    %34 = vector.shape_cast %30 : vector<2x8x8xf32> to vector<1x2x8x8xf32>
    %35 = vector.shape_cast %31 : vector<2x8x8xf32> to vector<1x2x8x8xf32>
    %36 = vector.shape_cast %32 : vector<2x8x8xf32> to vector<1x2x8x8xf32>
    %37 = tpu.concatenate %33, %34, %35, %36 in 0 : vector<1x2x8x8xf32>, vector<1x2x8x8xf32>, vector<1x2x8x8xf32>, vector<1x2x8x8xf32> -> vector<4x2x8x8xf32>
    %38 = vector.shape_cast %37 : vector<4x2x8x8xf32> to vector<8x8x8xf32>
    %39 = vector.shape_cast %16 : vector<16x32xf32> to vector<2x8x32xf32>
    %40 = vector.extract_strided_slice %39 {offsets = [0, 0, 0], sizes = [2, 8, 8], strides = [1, 1, 1]} : vector<2x8x32xf32> to vector<2x8x8xf32>
    %41 = vector.extract_strided_slice %39 {offsets = [0, 0, 8], sizes = [2, 8, 8], strides = [1, 1, 1]} : vector<2x8x32xf32> to vector<2x8x8xf32>
    %42 = vector.extract_strided_slice %39 {offsets = [0, 0, 16], sizes = [2, 8, 8], strides = [1, 1, 1]} : vector<2x8x32xf32> to vector<2x8x8xf32>
    %43 = vector.extract_strided_slice %39 {offsets = [0, 0, 24], sizes = [2, 8, 8], strides = [1, 1, 1]} : vector<2x8x32xf32> to vector<2x8x8xf32>
    %44 = vector.shape_cast %40 : vector<2x8x8xf32> to vector<1x2x8x8xf32>
    %45 = vector.shape_cast %41 : vector<2x8x8xf32> to vector<1x2x8x8xf32>
    %46 = vector.shape_cast %42 : vector<2x8x8xf32> to vector<1x2x8x8xf32>
    %47 = vector.shape_cast %43 : vector<2x8x8xf32> to vector<1x2x8x8xf32>
    %48 = tpu.concatenate %44, %45, %46, %47 in 0 : vector<1x2x8x8xf32>, vector<1x2x8x8xf32>, vector<1x2x8x8xf32>, vector<1x2x8x8xf32> -> vector<4x2x8x8xf32>
    %49 = vector.shape_cast %48 : vector<4x2x8x8xf32> to vector<8x8x8xf32>
    %c0_19 = arith.constant 0 : index
    %c0_20 = arith.constant 0 : index
    %50 = vector.load %arg4[%c0_19, %c0_20] : memref<8x8xf32, #tpu.memory_space<vmem>>, vector<8x8xf32>
    "tpu.trace_start"() <{level = 10 : i32, message = "bsd,btd->bst"}> : () -> ()
    %cst_21 = arith.constant dense<0.000000e+00> : vector<8x8x8xf32>
    %51 = tpu.matmul %27, %38, %cst_21 {dimension_numbers = #tpu.dot_dimension_numbers<[2], [2], [1], [1], [0, 0, 0, 1, 1, 1], [0], [0]>} : vector<8x8x8xf32>, vector<8x8x8xf32>, vector<8x8x8xf32> -> vector<8x8x8xf32>
    "tpu.trace_stop"() : () -> ()
    %cst_22 = arith.constant 0.353553385 : f32
    %52 = vector.broadcast %cst_22 : f32 to vector<8x8x8xf32>
    %53 = arith.mulf %51, %52 : vector<8x8x8xf32>
    %54 = vector.shape_cast %50 : vector<8x8xf32> to vector<1x8x8xf32>
    %55 = vector.broadcast %54 : vector<1x8x8xf32> to vector<8x8x8xf32>
    %56 = arith.addf %53, %55 : vector<8x8x8xf32>
    %cst_23 = arith.constant dense<0xFF800000> : vector<8x8xf32>
    %57 = vector.multi_reduction <maximumf>, %56, %cst_23 [2] : vector<8x8x8xf32> to vector<8x8xf32>
    %58 = vector.shape_cast %57 : vector<8x8xf32> to vector<8x8x1xf32>
    %59 = vector.broadcast %58 : vector<8x8x1xf32> to vector<8x8x8xf32>
    %60 = arith.subf %56, %59 : vector<8x8x8xf32>
    %61 = math.exp %60 : vector<8x8x8xf32>
    %cst_24 = arith.constant dense<0.000000e+00> : vector<8x8xf32>
    %62 = vector.multi_reduction <add>, %61, %cst_24 [2] : vector<8x8x8xf32> to vector<8x8xf32>
    %63 = vector.shape_cast %62 : vector<8x8xf32> to vector<8x8x1xf32>
    %64 = tpu.reciprocal %63 {approx = true} : vector<8x8x1xf32> -> vector<8x8x1xf32>
    %65 = vector.broadcast %64 : vector<8x8x1xf32> to vector<8x8x8xf32>
    %66 = arith.mulf %61, %65 : vector<8x8x8xf32>
    "tpu.trace_start"() <{level = 10 : i32, message = "bst,btd->bsd"}> : () -> ()
    %cst_25 = arith.constant dense<0.000000e+00> : vector<8x8x8xf32>
    %67 = tpu.matmul %66, %49, %cst_25 {dimension_numbers = #tpu.dot_dimension_numbers<[2], [1], [1], [2], [0, 0, 0, 1, 1, 2], [0], [0]>} : vector<8x8x8xf32>, vector<8x8x8xf32>, vector<8x8x8xf32> -> vector<8x8x8xf32>
    "tpu.trace_stop"() : () -> ()
    %68 = vector.shape_cast %67 : vector<8x8x8xf32> to vector<4x2x8x8xf32>
    %69 = vector.extract_strided_slice %68 {offsets = [0, 0, 0, 0], sizes = [1, 2, 8, 8], strides = [1, 1, 1, 1]} : vector<4x2x8x8xf32> to vector<1x2x8x8xf32>
    %70 = vector.shape_cast %69 : vector<1x2x8x8xf32> to vector<2x8x8xf32>
    %71 = vector.extract_strided_slice %68 {offsets = [1, 0, 0, 0], sizes = [1, 2, 8, 8], strides = [1, 1, 1, 1]} : vector<4x2x8x8xf32> to vector<1x2x8x8xf32>
    %72 = vector.shape_cast %71 : vector<1x2x8x8xf32> to vector<2x8x8xf32>
    %73 = vector.extract_strided_slice %68 {offsets = [2, 0, 0, 0], sizes = [1, 2, 8, 8], strides = [1, 1, 1, 1]} : vector<4x2x8x8xf32> to vector<1x2x8x8xf32>
    %74 = vector.shape_cast %73 : vector<1x2x8x8xf32> to vector<2x8x8xf32>
    %75 = vector.extract_strided_slice %68 {offsets = [3, 0, 0, 0], sizes = [1, 2, 8, 8], strides = [1, 1, 1, 1]} : vector<4x2x8x8xf32> to vector<1x2x8x8xf32>
    %76 = vector.shape_cast %75 : vector<1x2x8x8xf32> to vector<2x8x8xf32>
    %77 = tpu.concatenate %70, %72, %74, %76 in 2 : vector<2x8x8xf32>, vector<2x8x8xf32>, vector<2x8x8xf32>, vector<2x8x8xf32> -> vector<2x8x32xf32>
    %78 = vector.shape_cast %77 : vector<2x8x32xf32> to vector<16x32xf32>
    %cst_26 = arith.constant dense<0.000000e+00> : vector<16x32xf32>
    %79 = tpu.matmul %78, %7, %cst_26 {dimension_numbers = #tpu.dot_dimension_numbers<[1], [0], [0], [1], [0, 0, 1, 1], [], []>} : vector<16x32xf32>, vector<32x32xf32>, vector<16x32xf32> -> vector<16x32xf32>
    %80 = vector.shape_cast %79 : vector<16x32xf32> to vector<2x8x32xf32>
    %c0_27 = arith.constant 0 : index
    %c0_28 = arith.constant 0 : index
    %c0_29 = arith.constant 0 : index
    %81 = vector.load %arg6[%c0_27, %c0_28, %c0_29] : memref<2x8x32xf32, #tpu.memory_space<vmem>>, vector<2x8x32xf32>
    tpu.vector_store %arg6[%c0_27, %c0_28, %c0_29], %80 {strides = array<i32>} : memref<2x8x32xf32, #tpu.memory_space<vmem>>, vector<2x8x32xf32>,
    return
  }
  func.func @transform_0(%arg0: i32) -> (i32, i32, i32) {
    %c0_i32 = arith.constant 0 : i32
    %c0_i32_0 = arith.constant 0 : i32
    %c0_i32_1 = arith.constant 0 : i32
    return %arg0, %c0_i32, %c0_i32_0 : i32, i32, i32
  }
  func.func @transform_1(%arg0: i32) -> (i32, i32, i32) {
    %c0_i32 = arith.constant 0 : i32
    %c0_i32_0 = arith.constant 0 : i32
    %c0_i32_1 = arith.constant 0 : i32
    return %arg0, %c0_i32, %c0_i32_0 : i32, i32, i32
  }
  func.func @transform_2(%arg0: i32) -> (i32, i32, i32) {
    %c0_i32 = arith.constant 0 : i32
    %c0_i32_0 = arith.constant 0 : i32
    %c0_i32_1 = arith.constant 0 : i32
    return %arg0, %c0_i32, %c0_i32_0 : i32, i32, i32
  }
  func.func @transform_3(%arg0: i32) -> (i32, i32) {
    %c0_i32 = arith.constant 0 : i32
    %c0_i32_0 = arith.constant 0 : i32
    %c0_i32_1 = arith.constant 0 : i32
    return %c0_i32, %c0_i32_0 : i32, i32
  }
  func.func @transform_4(%arg0: i32) -> (i32, i32, i32) {
    %c0_i32 = arith.constant 0 : i32
    %c0_i32_0 = arith.constant 0 : i32
    %c0_i32_1 = arith.constant 0 : i32
    %c0_i32_2 = arith.constant 0 : i32
    return %c0_i32, %c0_i32_0, %c0_i32_1 : i32, i32, i32
  }
  func.func @transform_5(%arg0: i32) -> (i32, i32, i32) {
    %c0_i32 = arith.constant 0 : i32
    %c0_i32_0 = arith.constant 0 : i32
    %c0_i32_1 = arith.constant 0 : i32
    return %arg0, %c0_i32, %c0_i32_0 : i32, i32, i32
  }
}

</mosaic_0001>

<bundles_post_ra>
// kernel: tpu_custom_call.1
= control target key start
LH: loop header
LB: loop body
LE: loop exit
PB: predicated region body
PF: predicated region fallthrough
CT: control target
= control target key end

     0   :  { %s3272_s0 = inlined_call_operand.hbm [shape: f32[4,8,32], index: 0, kind: input, shape index: {}]   ;;  %s3273_s1 = inlined_call_operand.hbm [shape: f32[4,8,32], index: 1, kind: input, shape index: {}]   ;;  %s3274_s2 = inlined_call_operand.hbm [shape: f32[4,8,32], index: 2, kind: input, shape index: {}]   ;;  %s3275_s3 = inlined_call_operand.vmem [shape: f32[8,8], index: 3, kind: input, shape index: {}]   ;;  %s3276_s4 = inlined_call_operand.hbm [shape: f32[4,32,32], index: 4, kind: input, shape index: {}]   ;;  %s3277_s5 = inlined_call_operand.hbm [shape: f32[4,8,32], index: 5, kind: output, shape index: {}]  }
   0x1   :  { %3297 = sst [smem:[#allocation21_spill]] %s3272_s0 }
   0x2   :  { %3298 = sst [smem:[#allocation22_spill]] %s3273_s1 }
   0x3   :  { %10 = vsyncpa [#allocation3], 0 }
   0x4   :  { %12 = vsyncpa [#allocation3 + $0x1], 0 }
   0x5   :  { %13 = vsyncpa [#allocation6], 0 }
   0x6   :  { %15 = vsyncpa [#allocation6 + $0x1], 0 }
   0x7   :  { %16 = vsyncpa [#allocation9], 0 }
   0x8   :  { %17 = vsyncpa [#allocation4], 0 }
   0x9   :  { %19 = vsyncpa [#allocation4 + $0x1], 0  ;;  %s2815_s18 = smov 0   ;;  %s2817_s19 = smov 0  }
   0xa   :  { %s2819_s20 = smov 0   ;;  %s2821_s21 = smov 0  }
   0xb LB: > { %3299 = sst [smem:[#allocation15_spill]] %s2755_s18  ;;  %s2836_s22 = sadd.s32 1, %s2767_s21   ;;  %s2767_s21 = sphi %s2821_s21, %s3330_s21   ;;  %s2763_s20 = sphi %s2819_s20, %s3332_s20   ;;  %s2759_s19 = sphi %s2817_s19, %s3334_s19   ;;  %s2755_s18 = sphi %s2815_s18, %s3333_s18  }
   0xc   : > { %3300 = sst [smem:[#allocation16_spill]] %s2763_s20  ;;  %s32_s23 = sadd.s32 1, %s2763_s20 }
   0xd   : > { %3301 = sst [smem:[#allocation17_spill]] %s2767_s21  ;;  %s29_s24 = ssub.s32 %s2767_s21, %s2836_s22 }
   0xe   : > { %3302 = sst [smem:[#allocation18_spill]] %s2836_s22  ;;  %p3278_p0 = scmp.ne.s32.totalorder %s2763_s20, %s2759_s19 }
   0xf   : > { %p30_p1 = scmp.eq.s32.totalorder %s29_s24, 0  ;;  %p40_p2 = scmp.eq.s32.totalorder %s2767_s21, 0 }
  0x10   : > { %p2496_p5 = scmp.lt.s32.totalorder %s2767_s21, 2  ;;  %s205_s26 = sand.u32 1, %s2763_s20  }
  0x11   : > { %s2845_s25 = scalar_select %p30_p1, %s2763_s20, %s32_s23  }
  0x12   : > { %p41_p3 = por %p40_p2, %p3278_p0  ;;  %s2855_s27 = sshll.u32 %s205_s26, 4 }
  0x13   : > { %3303 = sst [smem:[#allocation19_spill]] %s2845_s25  ;;  %s2858_s28 = sshll.u32 %s2767_s21, 8 }
  0x14   : > { %p2860_p6 = pnand %p2496_p5, %p41_p3  ;;  %s226_s30 = sand.u32 1, %s2767_s21  }
  0x15   : > { %s3305_s1 = sld [smem:[#allocation22_spill]]  ;;  %s230_s9 = scalar_lea.vmem [#allocation5], %s2855_s27 }
  0x16   : > { %s3304_s29 = scalar_select %p2860_p6, 1, 0 }
  0x17   : > { %s237_s10 = sshll.u32 %s230_s9, 4  ;;  %s2874_s11 = scalar_lea.sflag [#allocation6], %s226_s30  ;;  %s2872_s10 = int_to_ptr.vmem [resolvable:$true] %s237_s10 }
  0x18   : > { %p2880_p8 = pneg %p2860_p6 }
  0x1a   : > { %s3306_s13 = scalar_select %p2880_p8, 1, 0 }
  0x1b   : > { %s2869_s8 = scalar_lea.hbm %s3305_s1, %s2858_s28  ;;  %s2580_s16 = scalar_lea.hbm %s3305_s1, 512 }
  0x1c   : > { %s2575_s12 = scalar_lea.hbm %s2869_s8, 256  ;;  %p2581_p11 = scmp.lt.u32.totalorder %s2869_s8, %s3305_s1 }
  0x1d   : > { %p2576_p7 = scmp.ne.s32.totalorder %s2869_s8, %s2575_s12  ;;  %p2582_p12 = scmp.lt.u32.totalorder %s2580_s16, %s2575_s12 }
  0x1e   : > { %p2584_p1 = scmp.lt.u32.totalorder %s2575_s12, %s2869_s8 }
  0x1f   : > { %p2578_p9 = pnand %p2880_p8, %p2576_p7  ;;  %p2583_p13 = por %p2582_p12, %p2581_p11 }
  0x21   : > { %p2579_p10 = pneg %p2578_p9  ;;  %p2585_p2 = por %p2584_p1, %p2583_p13 }
  0x23   : > { %p2586_p3 = pnand %p2585_p2, %p2579_p10 }
  0x25   : > { %2589 = shalt.err (!%p2586_p3)
}
  0x26   : > { %s2590_s24 = scalar_lea.vmem %s2872_s10, 256  ;;  %s2769_s30 = smov [#allocation5]  }
  0x27   : > { %p2591_p5 = scmp.ne.s32.totalorder %s2872_s10, %s2590_s24  ;;  %s2595_s6 = sshll.u32 %s2769_s30, 4  ;;  %s2596_s6 = int_to_ptr.vmem [resolvable:$false] %s2595_s6 }
  0x28   : > { %s2597_s7 = scalar_lea.vmem %s2596_s6, 512  ;;  %p2598_p4 = scmp.lt.s32.totalorder %s2872_s10, %s2596_s6 }
  0x29   : > { %p2593_p7 = pnand %p2591_p5, %p2880_p8  ;;  %p2599_p0 = scmp.lt.s32.totalorder %s2597_s7, %s2590_s24 }
  0x2b   : > { %p2594_p9 = pneg %p2593_p7  ;;  %p2600_p11 = por %p2599_p0, %p2598_p4 }
  0x2d   : > { %p2601_p12 = pnand %p2600_p11, %p2594_p9 }
  0x2f   : > { %2604 = shalt.err (!%p2601_p12)
}
  0x30   : > { %s3279_s9 = smov 128   ;;  %s3281_s12 = smov 8  }
  0x31   : > { %2487 = dma.hbm_to_vmem [thread:$0]  (!%p2860_p6), %s2869_s8, 256, %s2872_s10, %s2874_s11, %s3279_s9, %s3279_s9, %s3281_s12  }
  0x32   : > { %s2908_s14 = sadd.s32 4294967295, %s2767_s21   ;;  %s2193_s15 = sadd.s32 4294967294, %s2767_s21  }
  0x33   : > { %p45_p0 = scmp.ne.s32.totalorder %s2759_s19, %s2755_s18  ;;  %p3285_p4 = scmp.eq.s32.totalorder %s2908_s14, 0 }
  0x34   : > { %p163_p10 = scmp.eq.s32.totalorder %s2908_s14, 1  ;;  %p169_p13 = scmp.eq.s32.totalorder %s2193_s15, 1 }
  0x35   : > { %p2917_p1 = por %p3285_p4, %p45_p0  ;;  %p2194_p2 = scmp.ge.s32.totalorder %s2767_s21, 1 }
  0x36   : > { %p3308_p3 = scmp.ne.s32.totalorder %s2763_s20, %s2759_s19  ;;  %p2929_p7 = por %p169_p13, %p45_p0 }
  0x37   : > { %s3307_s16 = scalar_select %p2917_p1, 1, 0 }
  0x38   : > { %p2925_p5 = por %p163_p10, %p3308_p3  ;;  %p176_p9 = scmp.lt.s32.totalorder %s2767_s21, 3 }
  0x39   : > { %s3310_s10 = scalar_select %p2929_p7, 1, 0 }
  0x3a   : > { %s3309_s8 = scalar_select %p2925_p5, 1, 0 }
  0x3b   : > { %3311 = sst [smem:[#allocation20_spill]] %s3310_s10  ;;  %p2934_p11 = pnand %p2194_p2, %p176_p9 }
  0x3c   : > { %s2772_s23 = smov [#allocation8]   ;;  %s3313_s0 = sld [smem:[#allocation21_spill]] }
  0x3d   : > { %s3312_s17 = scalar_select %p2934_p11, 1, 0 }
  0x3e   : > { %s191_s24 = sshll.u32 %s2772_s23, 4  ;;  %p2477_p12 = pneg %p2934_p11  ;;  %s2938_s24 = int_to_ptr.vmem [resolvable:$true] %s191_s24 }
  0x3f   : > { %s209_s15 = scalar_lea.vmem [#allocation2], %s2855_s27  ;;  %s2959_s23 = scalar_lea.sflag [#allocation3], %s205_s26 }
  0x40   : > { %s216_s9 = sshll.u32 %s209_s15, 4  ;;  %p2951_p0 = pnand %p2477_p12, %p3285_p4  ;;  %s2955_s9 = int_to_ptr.vmem [resolvable:$true] %s216_s9 }
  0x42   : > { %s2946_s7 = scalar_lea.hbm %s3313_s0, %s2858_s28  ;;  %s2610_s25 = scalar_lea.hbm %s3313_s0, 512 }
  0x43   : > { %s3314_s12 = scalar_select %p2951_p0, 1, 0 }
  0x44   : > { %s2605_s1 = scalar_lea.hbm %s2946_s7, 256  ;;  %p2611_p3 = scmp.lt.u32.totalorder %s2946_s7, %s3313_s0 }
  0x45   : > { %p2606_p10 = scmp.ne.s32.totalorder %s2946_s7, %s2605_s1  ;;  %p2612_p9 = scmp.lt.u32.totalorder %s2610_s25, %s2605_s1 }
  0x46   : > { %p2614_p4 = scmp.lt.u32.totalorder %s2605_s1, %s2946_s7 }
  0x47   : > { %p2608_p13 = pnand %p2606_p10, %p2880_p8  ;;  %p2613_p12 = por %p2612_p9, %p2611_p3 }
  0x49   : > { %p2609_p2 = pneg %p2608_p13  ;;  %p2615_p7 = por %p2614_p4, %p2613_p12 }
  0x4b   : > { %p2616_p5 = pnand %p2615_p7, %p2609_p2 }
  0x4d   : > { %2619 = shalt.err (!%p2616_p5)
}
  0x4e   : > { %s2620_s26 = scalar_lea.vmem %s2955_s9, 256  ;;  %s2773_s30 = smov [#allocation2]  }
  0x4f   : > { %p2621_p10 = scmp.ne.s32.totalorder %s2955_s9, %s2620_s26  ;;  %s2625_s6 = sshll.u32 %s2773_s30, 4  ;;  %s2626_s6 = int_to_ptr.vmem [resolvable:$false] %s2625_s6 }
  0x50   : > { %s2627_s22 = scalar_lea.vmem %s2626_s6, 512  ;;  %p2628_p11 = scmp.lt.s32.totalorder %s2955_s9, %s2626_s6 }
  0x51   : > { %p2623_p13 = pnand %p2621_p10, %p2880_p8  ;;  %p2629_p0 = scmp.lt.s32.totalorder %s2627_s22, %s2620_s26 }
  0x53   : > { %p2624_p1 = pneg %p2623_p13  ;;  %p2630_p3 = por %p2629_p0, %p2628_p11 }
  0x55   : > { %p2631_p9 = pnand %p2630_p3, %p2624_p1 }
  0x57   : > { %2634 = shalt.err (!%p2631_p9)
}
  0x58   : > { %s3315_s1 = smov 8   ;;  %s3316_s25 = smov 128  }
  0x59   : > { %2484 = dma.hbm_to_vmem [thread:$0]  (!%p2860_p6), %s2946_s7, 256, %s2955_s9, %s2959_s23, %s3316_s25, %s3316_s25, %s3315_s1  }
  0x5a   : > { %s2990_s0 = scalar_lea.hbm %s3274_s2, %s2858_s28  ;;  %s2635_s22 = scalar_lea.hbm %s3276_s4, 2048 }
  0x5b   : > { %p2636_p4 = scmp.ne.s32.totalorder %s3276_s4, %s2635_s22  ;;  %p3317_p1 = scmp.ne.s32.totalorder %s3314_s12, 0 }
  0x5c   : > { %p2642_p0 = scmp.lt.u32.totalorder %s2635_s22, %s3276_s4 }
  0x5d   : > { %p2637_p5 = pneg %p3317_p1 }
  0x5f   : > { %p2638_p7 = pnand %p2637_p5, %p2636_p4 }
  0x61   : > { %p2639_p11 = pneg %p2638_p7 }
  0x63   : > { %p2644_p2 = pnand %p2642_p0, %p2639_p11 }
  0x65   : > { %2647 = shalt.err (!%p2644_p2)
}
  0x66   : > { %s2648_s28 = scalar_lea.vmem %s2938_s24, 2048  ;;  %p2656_p3 = scmp.lt.s32.totalorder %s2938_s24, %s2938_s24 }
  0x67   : > { %p2649_p12 = scmp.ne.s32.totalorder %s2938_s24, %s2648_s28  ;;  %p2657_p9 = scmp.lt.s32.totalorder %s2648_s28, %s2648_s28 }
  0x69   : > { %p2651_p10 = pnand %p2649_p12, %p2637_p5  ;;  %p2658_p6 = por %p2657_p9, %p2656_p3 }
  0x6b   : > { %p2652_p13 = pneg %p2651_p10 }
  0x6d   : > { %p2659_p8 = pnand %p2658_p6, %p2652_p13 }
  0x6f   : > { %2662 = shalt.err (!%p2659_p8)
}
  0x70   : > { %2480 = dma.hbm_to_vmem [thread:$0]  (!%p3317_p1), %s3276_s4, 2048, %s2938_s24, [#allocation9], %s3316_s25, %s3316_s25, %s3315_s1  }
  0x71   : > { %s251_s21 = scalar_lea.vmem [#allocation7], %s2855_s27  ;;  %s2663_s10 = scalar_lea.hbm %s2990_s0, 256 }
  0x72   : > { %s258_s9 = sshll.u32 %s251_s21, 4  ;;  %p2664_p6 = scmp.ne.s32.totalorder %s2990_s0, %s2663_s10  ;;  %s3017_s9 = int_to_ptr.vmem [resolvable:$true] %s258_s9 }
  0x73   : > { %p3318_p8 = scmp.ne.s32.totalorder %s3306_s13, 0  ;;  %s2668_s23 = scalar_lea.hbm %s3274_s2, 512 }
  0x74   : > { %p2669_p7 = scmp.lt.u32.totalorder %s2990_s0, %s3274_s2  ;;  %p2670_p11 = scmp.lt.u32.totalorder %s2668_s23, %s2663_s10 }
  0x75   : > { %p2666_p4 = pnand %p2664_p6, %p3318_p8  ;;  %p2672_p1 = scmp.lt.u32.totalorder %s2663_s10, %s2990_s0 }
  0x76   : > { %p2671_p0 = por %p2670_p11, %p2669_p7 }
  0x77   : > { %p2667_p5 = pneg %p2666_p4 }
  0x78   : > { %p2673_p2 = por %p2672_p1, %p2671_p0 }
  0x7a   : > { %p2674_p12 = pnand %p2673_p2, %p2667_p5 }
  0x7c   : > { %2677 = shalt.err (!%p2674_p12)
}
  0x7d   : > { %s2678_s27 = scalar_lea.vmem %s3017_s9, 256  ;;  %s2774_s24 = smov [#allocation7]  }
  0x7e   : > { %p2679_p10 = scmp.ne.s32.totalorder %s3017_s9, %s2678_s27  ;;  %s2683_s26 = sshll.u32 %s2774_s24, 4  ;;  %s2684_s26 = int_to_ptr.vmem [resolvable:$false] %s2683_s26 }
  0x7f   : > { %s2685_s6 = scalar_lea.vmem %s2684_s26, 512  ;;  %p2686_p9 = scmp.lt.s32.totalorder %s3017_s9, %s2684_s26 }
  0x80   : > { %p2681_p13 = pnand %p2679_p10, %p3318_p8  ;;  %p2687_p6 = scmp.lt.s32.totalorder %s2685_s6, %s2678_s27 }
  0x82   : > { %p2682_p3 = pneg %p2681_p13  ;;  %p2688_p4 = por %p2687_p6, %p2686_p9 }
  0x84   : > { %p2689_p7 = pnand %p2688_p4, %p2682_p3 }
  0x86   : > { %2692 = shalt.err (!%p2689_p7)
}
  0x87   : > { %p3319_p5 = scmp.ne.s32.totalorder %s3304_s29, 0  ;;  %p3320_p8 = scmp.ne.s32.totalorder %s3312_s17, 0 }
  0x88   : > { %s3047_s13 = sand.u32 (!%p3320_p8), 1, %s2759_s19   ;;  %p3321_p11 = scmp.ne.s32.totalorder (!%p3320_p8), %s3307_s16, 0 }
  0x89   : > { %2490 = dma.hbm_to_vmem [thread:$0]  (!%p3319_p5), %s2990_s0, 256, %s3017_s9, %s2874_s11, %s3316_s25, %s3316_s25, %s3315_s1  }
  0x8a   : > { %270 = sbr.rel (%p3320_p8) target bundleno = 1598 (0x63e), region = 40  ;;  %s3050_s22 = sshll.u32 (!%p3320_p8), %s3047_s13, 4 }
  0x8b   : > { %s273_s29 = scalar_lea.sflag (!%p3320_p8), [#allocation3], %s3047_s13  ;;  %s276_s28 = scalar_lea.vmem (!%p3320_p8), [#allocation2], %s3050_s22 }
  0x91   : > { %2738 = dma.done.wait (%p3321_p11), %s273_s29, 256  }
  0x92   : > { %2740 = vsyncadd (%p3321_p11), %s273_s29, 4294967040  ;;  %s281_s0 = sand.u32 1, %s2908_s14   ;;  %s285_s17 = scalar_lea.vmem [#allocation5], %s3050_s22 }
  0x93   : > { %s282_s11 = scalar_lea.sflag [#allocation6], %s281_s0 }
  0x94   : > { %2742 = dma.done.wait (%p3321_p11), %s282_s11, 512  }
  0x95   : > { %2744 = vsyncadd (%p3321_p11), %s282_s11, 4294966784  ;;  %s294_s1 = scalar_lea.vmem [#allocation7], %s3050_s22  ;;  %p3322_p0 = scmp.eq.s32.totalorder %s2908_s14, 0 }
  0x97   : > { %2746 = dma.done.wait (%p3322_p0), [#allocation9], 2048   ;;  %p3323_p1 = pmov %p3322_p0 }
  0x98   : > { %v344_v0 = vld [vmem:[#allocation8 + $0x20] sm:$0xff]  ;;  %v345_v1 = vld [vmem:[#allocation8 + $0x28] sm:$0xff]  ;;  %vm364_vm0 = vcmask 261120   ;;  %v346_v5 = vld [vmem:[#allocation8 + $0x30] sm:$0xff]  ;;  %v2775_v16 = vmov 0.0   ;;  %vm2776_vm1 = vmmov 0  }
  0x99   : > { %2748 = vsyncadd (%p3323_p1), [#allocation9], 4294965248  ;;  %v339_v2 = vld [vmem:[#allocation8] sm:$0xff]  ;;  %v2441_v3 = vpack.c.bf16 %v345_v1, %v344_v0  ;;  %v340_v4 = vld [vmem:[#allocation8 + $0x8] sm:$0xff]  ;;  %vm657_vm2 = vcmask 64512   ;;  %s2777_s16 = smov 120  }
  0x9a   : > { %v347_v6 = vld [vmem:[#allocation8 + $0x38] sm:$0xff]  ;;  %v2433_v7 = vpack.c.bf16 %v340_v4, %v339_v2  ;;  %v341_v9 = vld [vmem:[#allocation8 + $0x10] sm:$0xff]  ;;  %v349_v17 = vld [vmem:[#allocation8 + $0x40] sm:$0xff]  ;;  %s2778_s25 = smov 112   ;;  %s2779_s18 = smov 104   ;;  %vm1964_vm3 = vcmask 130048  }
  0x9b   : > { %v2445_v8 = vpack.c.bf16 %v347_v6, %v346_v5  ;;  %v342_v10 = vld [vmem:[#allocation8 + $0x18] sm:$0xff]  ;;  %v360_v11 = vld [vmem:[%s285_s17] sm:$0xff]  ;;  %2442 = vmatprep.subr.bf16.mxu1 %v2441_v3  ;;  %v350_v18 = vld [vmem:[#allocation8 + $0x48] sm:$0xff]  ;;  %s2780_s9 = smov 8   ;;  %s2781_s10 = smov 16   ;;  %vm1967_vm4 = vcmask 195584  }
  0x9c   : > { %v2437_v12 = vpack.c.bf16 %v342_v10, %v341_v9  ;;  %2328 = vmatprep.mubr.msk.f32.mxu1 %vm364_vm0, %v360_v11  ;;  %v358_v13 = vld [vmem:[%s276_s28] sm:$0xff]  ;;  %2444 = vmatpush3.bf16.msra.mxu1 %v2441_v3  ;;  %v361_v14 = vld [vmem:[%s285_s17 + $0x8] sm:$0xff]  ;;  %v2449_v19 = vpack.c.bf16 %v350_v18, %v349_v17  ;;  %s2782_s12 = smov 24   ;;  %s334_s7 = scalar_lea.vmem [#allocation10], %s3050_s22 }
  0x9d   : > { %2434 = vmatprep.subr.bf16.mxu0 %v2433_v7  ;;  %2446 = vmatprep.subr.bf16.mxu1 %v2445_v8  ;;  %v359_v15 = vld [vmem:[%s276_s28 + $0x8] sm:$0xff]  ;;  %v351_v20 = vld [vmem:[#allocation8 + $0x50] sm:$0xff]  ;;  %v656_v44 = vld [vmem:[%s3275_s3] sm:$0xff]  ;;  %s2067_s23 = sshll.u32 %s334_s7, 4  ;;  %s2252_s15 = sshll.u32 %s2908_s14, 8  ;;  %s3220_s23 = int_to_ptr.vmem [resolvable:$true] %s2067_s23 }
  0x9e   : > { %2436 = vmatpush3.bf16.msra.mxu0 %v2433_v7  ;;  %2317 = vmatprep.mubr.msk.f32.mxu0 %vm364_vm0, %v358_v13  ;;  %v352_v21 = vld [vmem:[#allocation8 + $0x58] sm:$0xff]  ;;  %v362_v23 = vld [vmem:[%s294_s1] sm:$0xff]  ;;  %s3225_s24 = scalar_lea.hbm %s3277_s5, %s2252_s15  ;;  %s2054_s26 = scalar_lea.sflag [#allocation4], %s3047_s13 }
  0x9f   : > { %2438 = vmatprep.subr.bf16.mxu0 %v2437_v12  ;;  %v2453_v22 = vpack.c.bf16 %v352_v21, %v351_v20  ;;  %v363_v24 = vld [vmem:[%s294_s1 + $0x8] sm:$0xff]  ;;  %s2693_s6 = scalar_lea.vmem %s3220_s23, 256  ;;  %p3324_p12 = scmp.ne.s32.totalorder %s3309_s8, 0 }
  0xa0   : > { %2448 = vmatpush3.bf16.msra.mxu1 %v2445_v8  ;;  %p2694_p2 = scmp.ne.s32.totalorder %s3220_s23, %s2693_s6  ;;  %s2783_s14 = smov [#allocation10]  }
  0xa1   : > { %2342 = vmatprep.subr.mxu1 %v2775_v16  ;;  %s2697_s22 = sshll.u32 %s2783_s14, 4  ;;  %s2698_s22 = int_to_ptr.vmem [resolvable:$false] %s2697_s22 }
  0xa2   : > { %2440 = vmatpush3.bf16.msra.mxu0 %v2437_v12  ;;  %p2695_p10 = pnand %p2694_p2, %p3324_p12  ;;  %s2699_s29 = scalar_lea.vmem %s2698_s22, 512 }
  0xa3   : > { %2329 = vmatmul.mubr.msk.f32.vlgmr.msra.gmra.mrb[0].mxu1 %vm364_vm0, %v361_v14  ;;  %2450 = vmatprep.subr.bf16.mxu0 %v2449_v19  ;;  %p2700_p3 = scmp.lt.s32.totalorder %s3220_s23, %s2698_s22  ;;  %p2701_p9 = scmp.lt.s32.totalorder %s2699_s29, %s2693_s6 }
  0xa4   : > { %2344 = vmatprep.mubr.msk.f32.mxu1 %vm2776_vm1, %v2775_v16  ;;  %p2696_p13 = pneg %p2695_p10 }
  0xa5   : > { %2318 = vmatmul.mubr.msk.f32.vlgmr.msra.gmra.mrb[0].mxu0 %vm364_vm0, %v359_v15  ;;  %p2702_p6 = por %p2701_p9, %p2700_p3 }
  0xa6   : > { %2452 = vmatpush3.bf16.msra.mxu0 %v2449_v19  ;;  %2339 = vmatprep.mubr.msk.f32.mxu0 %vm364_vm0, %v362_v23 }
  0xa7   : > { %2454 = vmatprep.subr.bf16.mxu0 %v2453_v22  ;;  %p2703_p4 = pnand %p2702_p6, %p2696_p13 }
  0xaa   : > { %2456 = vmatpush3.bf16.msra.mxu0 %v2453_v22 }
  0xab   : > { %2362 = vmatprep.subr.mxu0 %v2775_v16 }
  0xad   : > { %2340 = vmatmul.mubr.msk.f32.vlgmr.msra.gmra.mrb[2].mxu0 %vm364_vm0, %v363_v24 }
  0xae   : > { %2364 = vmatprep.mubr.msk.f32.mxu0 %vm2776_vm1, %v2775_v16 }
 0x176   : > { %v2330_v25 = vpop.f32.mrb[0].mxu1 }
 0x177   : > { %626 = vrot.lane.b32.xlu1 %v2330_v25, %s2777_s16  ;;  %v518_v26 = vpop.f32.mrb[1].mxu1 }
 0x178   : > { %v2319_v27 = vpop.f32.mrb[0].mxu0  ;;  %624 = vrot.lane.b32.xlu0 %v518_v26, %s2777_s16  ;;  %2343 = vmatpush3.xpose.msk.msra.mxu1 %vm657_vm2, %v518_v26 }
 0x179   : > { %v437_v28 = vpop.f32.mrb[1].mxu0  ;;  %2347 = vmatprep.subr.mxu1 %v2775_v16 }
 0x17b   : > { %612 = vrot.lane.b32.xlu1 %v2319_v27, %s2777_s16  ;;  %2345 = vmatmul.mubr.msk.f32.vlgmr.msra.gmra.mrb[2].mxu1 %vm657_vm2, %v437_v28 }
 0x17c   : > { %610 = vrot.lane.b32.xlu0 %v437_v28, %s2777_s16  ;;  %2348 = vmatpush3.xpose.msk.msra.mxu1 %vm657_vm2, %v2330_v25 }
 0x17d   : > { %2349 = vmatprep.mubr.msk.f32.mxu1 %vm2776_vm1, %v2775_v16  ;;  %2352 = vmatprep.subr.mxu1 %v2775_v16 }
 0x17f   : > { %630 = vrot.lane.b32.xlu1 %v2330_v25, %s2778_s25  ;;  %2350 = vmatmul.mubr.msk.f32.vlgmr.msra.gmra.mrb[4].mxu1 %vm657_vm2, %v2319_v27 }
 0x180   : > { %628 = vrot.lane.b32.xlu0 %v518_v26, %s2778_s25  ;;  %2354 = vmatprep.mubr.msk.f32.mxu1 %vm2776_vm1, %v2775_v16  ;;  %v3141_v41 = vpop.f32.mrb[2].mxu0 }
 0x181   : > { %v3143_v42 = vpop.f32.mrb[3].mxu0 }
 0x183   : > { %616 = vrot.lane.b32.xlu1 %v2319_v27, %s2778_s25 }
 0x184   : > { %614 = vrot.lane.b32.xlu0 %v437_v28, %s2778_s25 }
 0x187   : > { %634 = vrot.lane.b32.xlu1 %v2330_v25, %s2779_s18 }
 0x188   : > { %632 = vrot.lane.b32.xlu0 %v518_v26, %s2779_s18 }
 0x18b   : > { %620 = vrot.lane.b32.xlu1 %v2319_v27, %s2779_s18 }
 0x18c   : > { %618 = vrot.lane.b32.xlu0 %v437_v28, %s2779_s18 }
 0x1e9   : > { %v627_v29 = vpop.permute.xlu1 %626 }
 0x1ea   : > { %v625_v30 = vpop.permute.xlu0 %624 }
 0x1eb   : > { %2353 = vmatpush3.xpose.msk.msra.mxu1 %vm657_vm2, %v625_v30 }
 0x1ec   : > { %2357 = vmatprep.subr.mxu1 %v2775_v16 }
 0x1ed   : > { %v613_v31 = vpop.permute.xlu1 %612 }
 0x1ee   : > { %v611_v32 = vpop.permute.xlu0 %610 }
 0x1ef   : > { %2355 = vmatmul.mubr.msk.f32.vlgmr.msra.gmra.mrb[6].mxu1 %vm657_vm2, %v611_v32 }
 0x1f0   : > { %2358 = vmatpush3.xpose.msk.msra.mxu1 %vm657_vm2, %v627_v29  ;;  %2359 = vmatprep.mubr.msk.f32.mxu1 %vm2776_vm1, %v2775_v16 }
 0x1f1   : > { %v631_v33 = vpop.permute.xlu1 %630  ;;  %2367 = vmatprep.subr.mxu1 %v2775_v16 }
 0x1f2   : > { %v629_v34 = vpop.permute.xlu0 %628 }
 0x1f3   : > { %2360 = vmatmul.mubr.msk.f32.vlgmr.msra.gmra.mrb[8].mxu1 %vm657_vm2, %v613_v31  ;;  %2363 = vmatpush3.xpose.msk.msra.mxu0 %vm657_vm2, %v629_v34 }
 0x1f4   : > { %2368 = vmatpush3.xpose.msk.msra.mxu1 %vm657_vm2, %v631_v33  ;;  %2369 = vmatprep.mubr.msk.f32.mxu1 %vm2776_vm1, %v2775_v16 }
 0x1f5   : > { %v617_v35 = vpop.permute.xlu1 %616  ;;  %2377 = vmatprep.subr.mxu1 %v2775_v16  ;;  %2372 = vmatprep.subr.mxu0 %v2775_v16 }
 0x1f6   : > { %v615_v36 = vpop.permute.xlu0 %614 }
 0x1f7   : > { %2365 = vmatmul.mubr.msk.f32.vlgmr.msra.gmra.mrb[4].mxu0 %vm657_vm2, %v615_v36  ;;  %2370 = vmatmul.mubr.msk.f32.vlgmr.msra.gmra.mrb[10].mxu1 %vm657_vm2, %v617_v35 }
 0x1f8   : > { %2379 = vmatprep.mubr.msk.f32.mxu1 %vm2776_vm1, %v2775_v16  ;;  %2374 = vmatprep.mubr.msk.f32.mxu0 %vm2776_vm1, %v2775_v16 }
 0x1f9   : > { %v635_v37 = vpop.permute.xlu1 %634 }
 0x1fa   : > { %v633_v38 = vpop.permute.xlu0 %632  ;;  %2378 = vmatpush3.xpose.msk.msra.mxu1 %vm657_vm2, %v635_v37 }
 0x1fb   : > { %2373 = vmatpush3.xpose.msk.msra.mxu0 %vm657_vm2, %v633_v38  ;;  %2387 = vmatprep.subr.mxu1 %v2775_v16 }
 0x1fc   : > { %2382 = vmatprep.subr.mxu0 %v2775_v16 }
 0x1fd   : > { %v621_v39 = vpop.permute.xlu1 %620 }
 0x1fe   : > { %v619_v40 = vpop.permute.xlu0 %618  ;;  %2380 = vmatmul.mubr.msk.f32.vlgmr.msra.gmra.mrb[12].mxu1 %vm657_vm2, %v621_v39 }
 0x1ff   : > { %2375 = vmatmul.mubr.msk.f32.vlgmr.msra.gmra.mrb[6].mxu0 %vm657_vm2, %v619_v40  ;;  %2389 = vmatprep.mubr.msk.f32.mxu1 %vm2776_vm1, %v2775_v16 }
 0x200   : > { %2384 = vmatprep.mubr.msk.f32.mxu0 %vm2776_vm1, %v2775_v16  ;;  %2388 = vmatpush3.msra.mxu1 %v3141_v41 }
 0x201   : > { %2383 = vmatpush3.msra.mxu0 %v3143_v42  ;;  %2397 = vmatprep.subr.mxu1 %v2775_v16 }
 0x202   : > { %2392 = vmatprep.subr.mxu0 %v2775_v16 }
 0x24e   : > { %v728_v43 = vpop.f32.mrb[2].mxu1 }
 0x24f   : > { %v1250_v45 = vmul.f32 0.35355338, %v728_v43  ;;  %v2346_v46 = vpop.f32.mrb[3].mxu1 }
 0x251   : > { %v1258_v47 = vadd.f32 %v1250_v45, %v656_v44 }
 0x252   : > { %v802_v48 = vpop.f32.mrb[4].mxu1 }
 0x253   : > { %v1251_v49 = vmul.f32 0.35355338, %v802_v48  ;;  %v2351_v50 = vpop.f32.mrb[5].mxu1  ;;  %v1266_v51 = vsel %vm657_vm2, %v1258_v47, -inf }
 0x254   : > { %1267 = vmax.xlane.f32.xlu0 %v1266_v51 }
 0x255   : > { %v1259_v52 = vadd.f32 %v1251_v49, %v656_v44 }
 0x257   : > { %v1269_v53 = vsel %vm657_vm2, %v1259_v52, -inf }
 0x258   : > { %1270 = vmax.xlane.f32.xlu1 %v1269_v53 }
 0x2c2   : > { %v876_v54 = vpop.f32.mrb[6].mxu1 }
 0x2c3   : > { %v1252_v55 = vmul.f32 0.35355338, %v876_v54  ;;  %v2356_v56 = vpop.f32.mrb[7].mxu1 }
 0x2c5   : > { %v1260_v57 = vadd.f32 %v1252_v55, %v656_v44 }
 0x2c6   : > { %v950_v58 = vpop.f32.mrb[8].mxu1 }
 0x2c7   : > { %v1253_v59 = vmul.f32 0.35355338, %v950_v58  ;;  %v2361_v60 = vpop.f32.mrb[9].mxu1  ;;  %v1272_v61 = vsel %vm657_vm2, %v1260_v57, -inf }
 0x2c8   : > { %1273 = vmax.xlane.f32.xlu0 %v1272_v61 }
 0x2c9   : > { %v1261_v62 = vadd.f32 %v1253_v59, %v656_v44 }
 0x2ca   : > { %v1024_v63 = vpop.f32.mrb[4].mxu0  ;;  %v1098_v0 = vpop.f32.mrb[10].mxu1 }
 0x2cb   : > { %v1254_v1 = vmul.f32 0.35355338, %v1024_v63  ;;  %v1255_v2 = vmul.f32 0.35355338, %v1098_v0  ;;  %v2366_v3 = vpop.f32.mrb[5].mxu0  ;;  %v2371_v4 = vpop.f32.mrb[11].mxu1 }
 0x2cc   : > { %v1275_v5 = vsel %vm657_vm2, %v1261_v62, -inf }
 0x2cd   : > { %1276 = vmax.xlane.f32.xlu0 %v1275_v5  ;;  %v1263_v6 = vadd.f32 %v1255_v2, %v656_v44  ;;  %v1262_v7 = vadd.f32 %v1254_v1, %v656_v44 }
 0x2cf   : > { %v1281_v8 = vsel %vm657_vm2, %v1263_v6, -inf  ;;  %v1278_v9 = vsel %vm657_vm2, %v1262_v7, -inf }
 0x2d0   : > { %1279 = vmax.xlane.f32.xlu1 %v1278_v9 }
 0x2d1   : > { %1282 = vmax.xlane.f32.xlu0 %v1281_v8  ;;  %v1246_v10 = vpop.f32.mrb[12].mxu1 }
 0x2d2   : > { %v1257_v11 = vmul.f32 0.35355338, %v1246_v10  ;;  %v1172_v12 = vpop.f32.mrb[6].mxu0  ;;  %v2381_v13 = vpop.f32.mrb[13].mxu1 }
 0x2d3   : > { %v1256_v14 = vmul.f32 0.35355338, %v1172_v12  ;;  %v2376_v15 = vpop.f32.mrb[7].mxu0 }
 0x2d4   : > { %v1265_v17 = vadd.f32 %v1257_v11, %v656_v44 }
 0x2d5   : > { %v1264_v18 = vadd.f32 %v1256_v14, %v656_v44 }
 0x2d6   : > { %v1287_v19 = vsel %vm657_vm2, %v1265_v17, -inf }
 0x2d7   : > { %1288 = vmax.xlane.f32.xlu0 %v1287_v19  ;;  %v1284_v20 = vsel %vm657_vm2, %v1264_v18, -inf }
 0x2d8   : > { %1285 = vmax.xlane.f32.xlu1 %v1284_v20 }
 0x2e1   : > { %v1268_v24 = vpop.xlane.xlu0 %1267 }
 0x2e2   : > { %v1290_v25 = vsub.f32 %v1258_v47, %v1268_v24 }
 0x2e4   : > { %v1298_v26 = vmul.f32 1.442695, %v1290_v25 }
 0x2e5   : > { %v1271_v21 = vpop.xlane.xlu1 %1270 }
 0x2e6   : > { %v1291_v22 = vsub.f32 %v1259_v52, %v1271_v21 }
 0x2e8   : > { %v1300_v23 = vmul.f32 1.442695, %v1291_v22 }
 0x2e9   : > { %638 = vrot.lane.b32.xlu1 %v3143_v42, %s2777_s16 }
 0x2ea   : > { %2543 = vpow2.f32 %v1300_v23 }
 0x2eb   : > { %2545 = vpow2.f32 %v1298_v26 }
 0x2ed   : > { %640 = vrot.lane.b32.xlu0 %v3141_v41, %s2777_s16  ;;  %644 = vrot.lane.b32.xlu1 %v3143_v42, %s2778_s25 }
 0x2f1   : > { %646 = vrot.lane.b32.xlu1 %v3141_v41, %s2778_s25 }
 0x2f4   : > { %v2544_v27 = vpop.eup %2543 }
 0x2f5   : > { %v1317_v28 = vsel %vm657_vm2, %v2544_v27, 0.0  ;;  %v2546_v29 = vpop.eup %2545 }
 0x2f6   : > { %v1314_v30 = vsel %vm657_vm2, %v2546_v29, 0.0 }
 0x30c   : > { %1318 = vadd.xlane.f32.xlu0 %v1317_v28 }
 0x315   : > { %1315 = vadd.xlane.f32.xlu1 %v1314_v30 }
 0x355   : > { %v1274_v31 = vpop.xlane.xlu0 %1273 }
 0x356   : > { %v1292_v32 = vsub.f32 %v1260_v57, %v1274_v31 }
 0x358   : > { %v1302_v33 = vmul.f32 1.442695, %v1292_v32  ;;  %v354_v32 = vld [vmem:[#allocation8 + $0x60] sm:$0xff] }
 0x35a   : > { %2547 = vpow2.f32 %v1302_v33  ;;  %v1277_v34 = vpop.xlane.xlu0 %1276  ;;  %v355_v33 = vld [vmem:[#allocation8 + $0x68] sm:$0xff] }
 0x35b   : > { %v1293_v35 = vsub.f32 %v1261_v62, %v1277_v34  ;;  %v356_v34 = vld [vmem:[#allocation8 + $0x70] sm:$0xff] }
 0x35d   : > { %v1304_v36 = vmul.f32 1.442695, %v1293_v35  ;;  %v1280_v37 = vpop.xlane.xlu1 %1279  ;;  %v2457_v35 = vpack.c.bf16 %v355_v33, %v354_v32 }
 0x35e   : > { %v1283_v38 = vpop.xlane.xlu0 %1282  ;;  %v1294_v39 = vsub.f32 %v1262_v7, %v1280_v37 }
 0x35f   : > { %2549 = vpow2.f32 %v1304_v36  ;;  %v1295_v40 = vsub.f32 %v1263_v6, %v1283_v38  ;;  %v357_v36 = vld [vmem:[#allocation8 + $0x78] sm:$0xff] }
 0x360   : > { %v1306_v43 = vmul.f32 1.442695, %v1294_v39 }
 0x361   : > { %v1308_v44 = vmul.f32 1.442695, %v1295_v40 }
 0x362   : > { %2551 = vpow2.f32 %v1306_v43 }
 0x363   : > { %2553 = vpow2.f32 %v1308_v44 }
 0x364   : > { %v2548_v45 = vpop.eup %2547  ;;  %v1289_v46 = vpop.xlane.xlu0 %1288 }
 0x365   : > { %v1297_v47 = vsub.f32 %v1265_v17, %v1289_v46  ;;  %v1286_v48 = vpop.xlane.xlu1 %1285  ;;  %v1320_v49 = vsel %vm657_vm2, %v2548_v45, 0.0 }
 0x366   : > { %v1296_v50 = vsub.f32 %v1264_v18, %v1286_v48  ;;  %1321 = vadd.xlane.f32.xlu1 %v1320_v49 }
 0x367   : > { %v1312_v51 = vmul.f32 1.442695, %v1297_v47 }
 0x368   : > { %v1310_v52 = vmul.f32 1.442695, %v1296_v50  ;;  %v641_v0 = vpop.permute.xlu0 %640 }
 0x369   : > { %v2550_v53 = vpop.eup %2549  ;;  %2555 = vpow2.f32 %v1312_v51  ;;  %v639_v63 = vpop.permute.xlu1 %638 }
 0x36a   : > { %2557 = vpow2.f32 %v1310_v52  ;;  %v1323_v54 = vsel %vm657_vm2, %v2550_v53, 0.0 }
 0x36b   : > { %1324 = vadd.xlane.f32.xlu0 %v1323_v54 }
 0x36c   : > { %v2552_v55 = vpop.eup %2551 }
 0x36d   : > { %v2554_v56 = vpop.eup %2553  ;;  %v1326_v57 = vsel %vm657_vm2, %v2552_v55, 0.0  ;;  %v645_v1 = vpop.permute.xlu1 %644 }
 0x36e   : > { %v1329_v58 = vsel %vm657_vm2, %v2554_v56, 0.0  ;;  %1327 = vadd.xlane.f32.xlu1 %v1326_v57 }
 0x36f   : > { %1330 = vadd.xlane.f32.xlu0 %v1329_v58 }
 0x371   : > { %v647_v3 = vpop.permute.xlu1 %646 }
 0x373   : > { %v3174_v59 = vpop.eup %2555 }
 0x374   : > { %v3176_v60 = vpop.eup %2557  ;;  %v1335_v61 = vsel %vm657_vm2, %v3174_v59, 0.0 }
 0x375   : > { %1336 = vadd.xlane.f32.xlu0 %v1335_v61  ;;  %v1332_v62 = vsel %vm657_vm2, %v3176_v60, 0.0 }
 0x376   : > { %1333 = vadd.xlane.f32.xlu1 %v1332_v62 }
 0x387   : > { %652 = vrot.lane.b32.xlu1 %v3141_v41, %s2779_s18 }
 0x38b   : > { %650 = vrot.lane.b32.xlu0 %v3143_v42, %s2779_s18 }
 0x399   : > { %v1319_v2 = vpop.xlane.xlu0 %1318 }
 0x39a   : > { %2559 = vrcp.f32 %v1319_v2 }
 0x3a2   : > { %v1316_v4 = vpop.xlane.xlu1 %1315 }
 0x3a3   : > { %2561 = vrcp.f32 %v1316_v4 }
 0x3a4   : > { %v2560_v5 = vpop.eup %2559 }
 0x3a5   : > { %v1347_v6 = vmul.f32 %v2560_v5, %v2544_v27 }
 0x3a7   : > { %2390 = vmatmul.mubr.msk.f32.vlgmr.msra.gmra.mrb[14].mxu1 %vm657_vm2, %v1347_v6 }
 0x3a8   : > { %2398 = vmatpush3.msra.mxu1 %v641_v0  ;;  %2399 = vmatprep.mubr.msk.f32.mxu1 %vm2776_vm1, %v2775_v16 }
 0x3a9   : > { %2407 = vmatprep.subr.mxu1 %v2775_v16 }
 0x3ad   : > { %v2562_v41 = vpop.eup %2561 }
 0x3ae   : > { %v1346_v42 = vmul.f32 %v2562_v41, %v2546_v29 }
 0x3b0   : > { %2385 = vmatmul.mubr.msk.f32.vlgmr.msra.gmra.mrb[8].mxu0 %vm657_vm2, %v1346_v42 }
 0x3b1   : > { %2393 = vmatpush3.msra.mxu0 %v639_v63  ;;  %2394 = vmatprep.mubr.msk.f32.mxu0 %vm2776_vm1, %v2775_v16 }
 0x3b2   : > { %2402 = vmatprep.subr.mxu0 %v2775_v16 }
 0x3f3   : > { %v1322_v7 = vpop.xlane.xlu1 %1321 }
 0x3f4   : > { %2563 = vrcp.f32 %v1322_v7 }
 0x3f8   : > { %v1325_v8 = vpop.xlane.xlu0 %1324 }
 0x3f9   : > { %2565 = vrcp.f32 %v1325_v8 }
 0x3fb   : > { %v1328_v9 = vpop.xlane.xlu1 %1327 }
 0x3fc   : > { %v1331_v10 = vpop.xlane.xlu0 %1330  ;;  %2567 = vrcp.f32 %v1328_v9 }
 0x3fd   : > { %2569 = vrcp.f32 %v1331_v10 }
 0x3fe   : > { %v2564_v11 = vpop.eup %2563 }
 0x3ff   : > { %v1348_v12 = vmul.f32 %v2564_v11, %v2548_v45 }
 0x401   : > { %2395 = vmatmul.mubr.msk.f32.vlgmr.msra.gmra.mrb[10].mxu0 %vm657_vm2, %v1348_v12 }
 0x402   : > { %2403 = vmatpush3.msra.mxu0 %v645_v1  ;;  %v1337_v13 = vpop.xlane.xlu0 %1336  ;;  %2404 = vmatprep.mubr.msk.f32.mxu0 %vm2776_vm1, %v2775_v16 }
 0x403   : > { %v2566_v14 = vpop.eup %2565  ;;  %2571 = vrcp.f32 %v1337_v13  ;;  %v1334_v15 = vpop.xlane.xlu1 %1333  ;;  %2412 = vmatprep.subr.mxu0 %v2775_v16 }
 0x404   : > { %v1349_v17 = vmul.f32 %v2566_v14, %v2550_v53  ;;  %2573 = vrcp.f32 %v1334_v15 }
 0x406   : > { %v2568_v18 = vpop.eup %2567  ;;  %2400 = vmatmul.mubr.msk.f32.vlgmr.msra.gmra.mrb[16].mxu1 %vm657_vm2, %v1349_v17  ;;  %v651_v23 = vpop.permute.xlu0 %650 }
 0x407   : > { %v2570_v19 = vpop.eup %2569  ;;  %v1350_v20 = vmul.f32 %v2568_v18, %v2552_v55  ;;  %2408 = vmatpush3.msra.mxu1 %v647_v3  ;;  %2409 = vmatprep.mubr.msk.f32.mxu1 %vm2776_vm1, %v2775_v16  ;;  %v653_v22 = vpop.permute.xlu1 %652 }
 0x408   : > { %v1351_v21 = vmul.f32 %v2570_v19, %v2554_v56  ;;  %2417 = vmatprep.subr.mxu1 %v2775_v16 }
 0x409   : > { %2405 = vmatmul.mubr.msk.f32.vlgmr.msra.gmra.mrb[12].mxu0 %vm657_vm2, %v1350_v20 }
 0x40a   : > { %2410 = vmatmul.mubr.msk.f32.vlgmr.msra.gmra.mrb[18].mxu1 %vm657_vm2, %v1351_v21  ;;  %2413 = vmatpush3.msra.mxu0 %v651_v23 }
 0x40b   : > { %2418 = vmatpush3.msra.mxu1 %v653_v22  ;;  %2419 = vmatprep.mubr.msk.f32.mxu1 %vm2776_vm1, %v2775_v16 }
 0x40c   : > { %2414 = vmatprep.mubr.msk.f32.mxu0 %vm2776_vm1, %v2775_v16  ;;  %v2461_v16 = vpack.c.bf16 %v357_v36, %v356_v34  ;;  %2458 = vmatprep.subr.bf16.mxu0 %v2457_v35 }
 0x40d   : > { %v2572_v24 = vpop.eup %2571 }
 0x40e   : > { %v2574_v25 = vpop.eup %2573  ;;  %v1353_v26 = vmul.f32 %v2572_v24, %v3174_v59 }
 0x40f   : > { %v1352_v27 = vmul.f32 %v2574_v25, %v3176_v60 }
 0x410   : > { %2420 = vmatmul.mubr.msk.f32.vlgmr.msra.gmra.mrb[20].mxu1 %vm657_vm2, %v1353_v26 }
 0x411   : > { %2415 = vmatmul.mubr.msk.f32.vlgmr.msra.gmra.mrb[14].mxu0 %vm657_vm2, %v1352_v27 }
 0x412   : > { %2460 = vmatpush3.bf16.msra.mxu0 %v2457_v35 }
 0x413   : > { %2462 = vmatprep.subr.bf16.mxu0 %v2461_v16 }
 0x416   : > { %2464 = vmatpush3.bf16.msra.mxu0 %v2461_v16 }
 0x47a   : > { %v1496_v28 = vpop.f32.mrb[14].mxu1 }
 0x47b   : > { %v2391_v29 = vpop.f32.mrb[15].mxu1 }
 0x483   : > { %v1423_v30 = vpop.f32.mrb[8].mxu0 }
 0x484   : > { %v2386_v31 = vpop.f32.mrb[9].mxu0 }
 0x4d4   : > { %v1569_v37 = vpop.f32.mrb[10].mxu0 }
 0x4d5   : > { %1940 = vrot.lane.b32.xlu0 %v1569_v37, %s2780_s9  ;;  %v2396_v38 = vpop.f32.mrb[11].mxu0 }
 0x4d9   : > { %v1642_v39 = vpop.f32.mrb[16].mxu1 }
 0x4da   : > { %v2401_v40 = vpop.f32.mrb[17].mxu1  ;;  %1942 = vrot.lane.b32.xlu1 %v1642_v39, %s2780_s9 }
 0x4dc   : > { %v1715_v43 = vpop.f32.mrb[12].mxu0 }
 0x4dd   : > { %v1788_v44 = vpop.f32.mrb[18].mxu1  ;;  %1948 = vrot.lane.b32.xlu0 %v1715_v43, %s2781_s10  ;;  %v2406_v45 = vpop.f32.mrb[13].mxu0 }
 0x4de   : > { %1950 = vrot.lane.b32.xlu1 %v1788_v44, %s2781_s10  ;;  %v2411_v46 = vpop.f32.mrb[19].mxu1 }
 0x4e3   : > { %v1934_v47 = vpop.f32.mrb[20].mxu1 }
 0x4e4   : > { %1958 = vrot.lane.b32.xlu1 %v1934_v47, %s2782_s12  ;;  %v1861_v48 = vpop.f32.mrb[14].mxu0  ;;  %v2421_v49 = vpop.f32.mrb[21].mxu1 }
 0x4e5   : > { %1956 = vrot.lane.b32.xlu0 %v1861_v48, %s2782_s12  ;;  %v2416_v50 = vpop.f32.mrb[15].mxu0 }
 0x547   : > { %v1941_v52 = vpop.permute.xlu0 %1940 }
 0x548   : > { %v1962_v55 = vsel %vm657_vm2, %v1423_v30, %v1941_v52 }
 0x54c   : > { %v1943_v51 = vpop.permute.xlu1 %1942 }
 0x54d   : > { %v1963_v57 = vsel %vm657_vm2, %v1496_v28, %v1943_v51 }
 0x54f   : > { %v1949_v54 = vpop.permute.xlu0 %1948 }
 0x550   : > { %v1951_v53 = vpop.permute.xlu1 %1950  ;;  %v1965_v58 = vsel %vm1964_vm3, %v1962_v55, %v1949_v54 }
 0x551   : > { %v1966_v60 = vsel %vm1964_vm3, %v1963_v57, %v1951_v53 }
 0x556   : > { %v1959_v56 = vpop.permute.xlu1 %1958 }
 0x557   : > { %v1957_v59 = vpop.permute.xlu0 %1956  ;;  %v1969_v62 = vsel %vm1967_vm4, %v1966_v60, %v1959_v56 }
 0x558   : > { %v1968_v61 = vsel %vm1967_vm4, %v1965_v58, %v1957_v59 }
 0x559   : > { %2430 = vmatprep.mubr.msk.f32.mxu0 %vm364_vm0, %v1968_v61 }
 0x55a   : > { %2431 = vmatmul.mubr.msk.f32.vlgmr.msra.gmra.mrb[16].mxu0 %vm364_vm0, %v1969_v62 }
 0x62d   : > { %v2432_v63 = vpop.f32.mrb[16].mxu0 }
 0x62e   : > { %2052 = vst.msk [vmem:[%s334_s7 + $0x8] sm:$0xff] %vm364_vm0, %v2432_v63  ;;  %v2042_v0 = vpop.f32.mrb[17].mxu0 }
 0x62f   : > { %2051 = vst.msk [vmem:[%s334_s7] sm:$0xff] %vm364_vm0, %v2042_v0 }
 0x630   : > { %2706 = shalt.err (!%p2703_p4)
}
 0x631   : > { %s2707_s28 = scalar_lea.hbm %s3225_s24, 256  ;;  %s2711_s17 = scalar_lea.hbm %s3277_s5, 512 }
 0x632   : > { %p2708_p7 = scmp.ne.s32.totalorder %s3225_s24, %s2707_s28  ;;  %p2712_p11 = scmp.lt.u32.totalorder %s3225_s24, %s3277_s5 }
 0x633   : > { %p2713_p0 = scmp.lt.u32.totalorder %s2711_s17, %s2707_s28  ;;  %p2715_p2 = scmp.lt.u32.totalorder %s2707_s28, %s3225_s24 }
 0x634   : > { %p2709_p5 = pnand %p2708_p7, %p3324_p12 }
 0x635   : > { %p2714_p1 = por %p2713_p0, %p2712_p11 }
 0x636   : > { %p2710_p8 = pneg %p2709_p5 }
 0x637   : > { %p2716_p10 = por %p2715_p2, %p2714_p1 }
 0x639   : > { %p2717_p13 = pnand %p2716_p10, %p2710_p8 }
 0x63b   : > { %2720 = shalt.err (!%p2717_p13)
}
 0x63c   : > { %s2784_s25 = smov 128  }
 0x63d   : > { %2475 = dma.vmem_to_hbm [thread:$0]  (%p3324_p12), %s3220_s23, 256, %s3225_s24, %s2054_s26, %s2784_s25, %s2784_s25, %s2780_s9  }
 0x63e PF: > { %s3325_s18 = sld [smem:[#allocation15_spill]]  ;;  %s3326_s20 = sld [smem:[#allocation20_spill]] }
 0x63f   : > { %s3327_s21 = sld [smem:[#allocation17_spill]] }
 0x644   : > { %s2082_s10 = sand.u32 1, %s3325_s18   ;;  %p3328_p3 = scmp.ne.s32.totalorder %s3326_s20, 0 }
 0x645   : > { %p3329_p9 = scmp.ge.s32.totalorder %s3327_s21, 2  ;;  %s2083_s12 = scalar_lea.sflag [#allocation4], %s2082_s10 }
 0x647   : > { %p2492_p6 = pnand %p3329_p9, %p3328_p3 }
 0x649   : > { %2750 = dma.done.wait (!%p2492_p6), %s2083_s12, 256  }
 0x64a   : > { %2752 = vsyncadd (!%p2492_p6), %s2083_s12, 4294967040  ;;  %s3330_s21 = sld [smem:[#allocation18_spill]]  ;;  %s3331_s8 = sld [smem:[#allocation16_spill]] }
 0x64b   : > { %s3332_s20 = sld [smem:[#allocation19_spill]]  ;;  %s3333_s18 = smov %s2759_s19 }
 0x650   : > { %p22_p4 = scmp.ge.s32.totalorder %s3330_s21, 4   ;;  %s3334_s19 = smov %s3331_s8 }
 0x652   :  { %24 = sbr.rel (!%p22_p4) target bundleno = 11 (0xb), region = 116 }
 0x659   :  { %2088 = vsyncpa [#allocation3], 1 }
 0x65a   :  { %2090 = vsyncpa [#allocation3 + $0x1], 1 }
 0x65b   :  { %2091 = vsyncpa [#allocation6], 1 }
 0x65c   :  { %2093 = vsyncpa [#allocation6 + $0x1], 1 }
 0x65d   :  { %2094 = vsyncpa [#allocation9], 1 }
 0x65e   :  { %2095 = vsyncpa [#allocation4], 1 }
 0x65f   :  { %2097 = vsyncpa [#allocation4 + $0x1], 1 }

// kernel: tpu_custom_call.1
= control target key start
LH: loop header
LB: loop body
LE: loop exit
PB: predicated region body
PF: predicated region fallthrough
CT: control target
= control target key end

     0   :  { %s3272_s0 = inlined_call_operand.hbm [shape: f32[4,8,32], index: 0, kind: input, shape index: {}]   ;;  %s3273_s1 = inlined_call_operand.hbm [shape: f32[4,8,32], index: 1, kind: input, shape index: {}]   ;;  %s3274_s2 = inlined_call_operand.hbm [shape: f32[4,8,32], index: 2, kind: input, shape index: {}]   ;;  %s3275_s3 = inlined_call_operand.vmem [shape: f32[8,8], index: 3, kind: input, shape index: {}]   ;;  %s3276_s4 = inlined_call_operand.hbm [shape: f32[4,32,32], index: 4, kind: input, shape index: {}]   ;;  %s3277_s5 = inlined_call_operand.hbm [shape: f32[4,8,32], index: 5, kind: output, shape index: {}]  }
   0x1   :  { %3297 = sst [smem:[#allocation21_spill]] %s3272_s0 }
   0x2   :  { %3298 = sst [smem:[#allocation22_spill]] %s3273_s1 }
   0x3   :  { %10 = vsyncpa [#allocation3], 0 }
   0x4   :  { %12 = vsyncpa [#allocation3 + $0x1], 0 }
   0x5   :  { %13 = vsyncpa [#allocation6], 0 }
   0x6   :  { %15 = vsyncpa [#allocation6 + $0x1], 0 }
   0x7   :  { %16 = vsyncpa [#allocation9], 0 }
   0x8   :  { %17 = vsyncpa [#allocation4], 0 }
   0x9   :  { %19 = vsyncpa [#allocation4 + $0x1], 0  ;;  %s2815_s18 = smov 0   ;;  %s2817_s19 = smov 0  }
   0xa   :  { %s2819_s20 = smov 0   ;;  %s2821_s21 = smov 0  }
   0xb LB: > { %3299 = sst [smem:[#allocation15_spill]] %s2755_s18  ;;  %s2836_s22 = sadd.s32 1, %s2767_s21   ;;  %s2767_s21 = sphi %s2821_s21, %s3330_s21   ;;  %s2763_s20 = sphi %s2819_s20, %s3332_s20   ;;  %s2759_s19 = sphi %s2817_s19, %s3334_s19   ;;  %s2755_s18 = sphi %s2815_s18, %s3333_s18  }
   0xc   : > { %3300 = sst [smem:[#allocation16_spill]] %s2763_s20  ;;  %s32_s23 = sadd.s32 1, %s2763_s20 }
   0xd   : > { %3301 = sst [smem:[#allocation17_spill]] %s2767_s21  ;;  %s29_s24 = ssub.s32 %s2767_s21, %s2836_s22 }
   0xe   : > { %3302 = sst [smem:[#allocation18_spill]] %s2836_s22  ;;  %p3278_p0 = scmp.ne.s32.totalorder %s2763_s20, %s2759_s19 }
   0xf   : > { %p30_p1 = scmp.eq.s32.totalorder %s29_s24, 0  ;;  %p40_p2 = scmp.eq.s32.totalorder %s2767_s21, 0 }
  0x10   : > { %p2496_p5 = scmp.lt.s32.totalorder %s2767_s21, 2  ;;  %s205_s26 = sand.u32 1, %s2763_s20  }
  0x11   : > { %s2845_s25 = scalar_select %p30_p1, %s2763_s20, %s32_s23  }
  0x12   : > { %p41_p3 = por %p40_p2, %p3278_p0  ;;  %s2855_s27 = sshll.u32 %s205_s26, 4 }
  0x13   : > { %3303 = sst [smem:[#allocation19_spill]] %s2845_s25  ;;  %s2858_s28 = sshll.u32 %s2767_s21, 8 }
  0x14   : > { %p2860_p6 = pnand %p2496_p5, %p41_p3  ;;  %s226_s30 = sand.u32 1, %s2767_s21  }
  0x15   : > { %s3305_s1 = sld [smem:[#allocation22_spill]]  ;;  %s230_s9 = scalar_lea.vmem [#allocation5], %s2855_s27 }
  0x16   : > { %s3304_s29 = scalar_select %p2860_p6, 1, 0 }
  0x17   : > { %s237_s10 = sshll.u32 %s230_s9, 4  ;;  %s2874_s11 = scalar_lea.sflag [#allocation6], %s226_s30  ;;  %s2872_s10 = int_to_ptr.vmem [resolvable:$true] %s237_s10 }
  0x18   : > { %p2880_p8 = pneg %p2860_p6 }
  0x1a   : > { %s3306_s13 = scalar_select %p2880_p8, 1, 0 }
  0x1b   : > { %s2869_s8 = scalar_lea.hbm %s3305_s1, %s2858_s28  ;;  %s2580_s16 = scalar_lea.hbm %s3305_s1, 512 }
  0x1c   : > { %s2575_s12 = scalar_lea.hbm %s2869_s8, 256  ;;  %p2581_p11 = scmp.lt.u32.totalorder %s2869_s8, %s3305_s1 }
  0x1d   : > { %p2576_p7 = scmp.ne.s32.totalorder %s2869_s8, %s2575_s12  ;;  %p2582_p12 = scmp.lt.u32.totalorder %s2580_s16, %s2575_s12 }
  0x1e   : > { %p2584_p1 = scmp.lt.u32.totalorder %s2575_s12, %s2869_s8 }
  0x1f   : > { %p2578_p9 = pnand %p2880_p8, %p2576_p7  ;;  %p2583_p13 = por %p2582_p12, %p2581_p11 }
  0x21   : > { %p2579_p10 = pneg %p2578_p9  ;;  %p2585_p2 = por %p2584_p1, %p2583_p13 }
  0x23   : > { %p2586_p3 = pnand %p2585_p2, %p2579_p10 }
  0x25   : > { %2589 = shalt.err (!%p2586_p3)
}
  0x26   : > { %s2590_s24 = scalar_lea.vmem %s2872_s10, 256  ;;  %s2769_s30 = smov [#allocation5]  }
  0x27   : > { %p2591_p5 = scmp.ne.s32.totalorder %s2872_s10, %s2590_s24  ;;  %s2595_s6 = sshll.u32 %s2769_s30, 4  ;;  %s2596_s6 = int_to_ptr.vmem [resolvable:$false] %s2595_s6 }
  0x28   : > { %s2597_s7 = scalar_lea.vmem %s2596_s6, 512  ;;  %p2598_p4 = scmp.lt.s32.totalorder %s2872_s10, %s2596_s6 }
  0x29   : > { %p2593_p7 = pnand %p2591_p5, %p2880_p8  ;;  %p2599_p0 = scmp.lt.s32.totalorder %s2597_s7, %s2590_s24 }
  0x2b   : > { %p2594_p9 = pneg %p2593_p7  ;;  %p2600_p11 = por %p2599_p0, %p2598_p4 }
  0x2d   : > { %p2601_p12 = pnand %p2600_p11, %p2594_p9 }
  0x2f   : > { %2604 = shalt.err (!%p2601_p12)
}
  0x30   : > { %s3279_s9 = smov 128   ;;  %s3281_s12 = smov 8  }
  0x31   : > { %2487 = dma.hbm_to_vmem [thread:$0]  (!%p2860_p6), %s2869_s8, 256, %s2872_s10, %s2874_s11, %s3279_s9, %s3279_s9, %s3281_s12  }
  0x32   : > { %s2908_s14 = sadd.s32 4294967295, %s2767_s21   ;;  %s2193_s15 = sadd.s32 4294967294, %s2767_s21  }
  0x33   : > { %p45_p0 = scmp.ne.s32.totalorder %s2759_s19, %s2755_s18  ;;  %p3285_p4 = scmp.eq.s32.totalorder %s2908_s14, 0 }
  0x34   : > { %p163_p10 = scmp.eq.s32.totalorder %s2908_s14, 1  ;;  %p169_p13 = scmp.eq.s32.totalorder %s2193_s15, 1 }
  0x35   : > { %p2917_p1 = por %p3285_p4, %p45_p0  ;;  %p2194_p2 = scmp.ge.s32.totalorder %s2767_s21, 1 }
  0x36   : > { %p3308_p3 = scmp.ne.s32.totalorder %s2763_s20, %s2759_s19  ;;  %p2929_p7 = por %p169_p13, %p45_p0 }
  0x37   : > { %s3307_s16 = scalar_select %p2917_p1, 1, 0 }
  0x38   : > { %p2925_p5 = por %p163_p10, %p3308_p3  ;;  %p176_p9 = scmp.lt.s32.totalorder %s2767_s21, 3 }
  0x39   : > { %s3310_s10 = scalar_select %p2929_p7, 1, 0 }
  0x3a   : > { %s3309_s8 = scalar_select %p2925_p5, 1, 0 }
  0x3b   : > { %3311 = sst [smem:[#allocation20_spill]] %s3310_s10  ;;  %p2934_p11 = pnand %p2194_p2, %p176_p9 }
  0x3c   : > { %s2772_s23 = smov [#allocation8]   ;;  %s3313_s0 = sld [smem:[#allocation21_spill]] }
  0x3d   : > { %s3312_s17 = scalar_select %p2934_p11, 1, 0 }
  0x3e   : > { %s191_s24 = sshll.u32 %s2772_s23, 4  ;;  %p2477_p12 = pneg %p2934_p11  ;;  %s2938_s24 = int_to_ptr.vmem [resolvable:$true] %s191_s24 }
  0x3f   : > { %s209_s15 = scalar_lea.vmem [#allocation2], %s2855_s27  ;;  %s2959_s23 = scalar_lea.sflag [#allocation3], %s205_s26 }
  0x40   : > { %s216_s9 = sshll.u32 %s209_s15, 4  ;;  %p2951_p0 = pnand %p2477_p12, %p3285_p4  ;;  %s2955_s9 = int_to_ptr.vmem [resolvable:$true] %s216_s9 }
  0x42   : > { %s2946_s7 = scalar_lea.hbm %s3313_s0, %s2858_s28  ;;  %s2610_s25 = scalar_lea.hbm %s3313_s0, 512 }
  0x43   : > { %s3314_s12 = scalar_select %p2951_p0, 1, 0 }
  0x44   : > { %s2605_s1 = scalar_lea.hbm %s2946_s7, 256  ;;  %p2611_p3 = scmp.lt.u32.totalorder %s2946_s7, %s3313_s0 }
  0x45   : > { %p2606_p10 = scmp.ne.s32.totalorder %s2946_s7, %s2605_s1  ;;  %p2612_p9 = scmp.lt.u32.totalorder %s2610_s25, %s2605_s1 }
  0x46   : > { %p2614_p4 = scmp.lt.u32.totalorder %s2605_s1, %s2946_s7 }
  0x47   : > { %p2608_p13 = pnand %p2606_p10, %p2880_p8  ;;  %p2613_p12 = por %p2612_p9, %p2611_p3 }
  0x49   : > { %p2609_p2 = pneg %p2608_p13  ;;  %p2615_p7 = por %p2614_p4, %p2613_p12 }
  0x4b   : > { %p2616_p5 = pnand %p2615_p7, %p2609_p2 }
  0x4d   : > { %2619 = shalt.err (!%p2616_p5)
}
  0x4e   : > { %s2620_s26 = scalar_lea.vmem %s2955_s9, 256  ;;  %s2773_s30 = smov [#allocation2]  }
  0x4f   : > { %p2621_p10 = scmp.ne.s32.totalorder %s2955_s9, %s2620_s26  ;;  %s2625_s6 = sshll.u32 %s2773_s30, 4  ;;  %s2626_s6 = int_to_ptr.vmem [resolvable:$false] %s2625_s6 }
  0x50   : > { %s2627_s22 = scalar_lea.vmem %s2626_s6, 512  ;;  %p2628_p11 = scmp.lt.s32.totalorder %s2955_s9, %s2626_s6 }
  0x51   : > { %p2623_p13 = pnand %p2621_p10, %p2880_p8  ;;  %p2629_p0 = scmp.lt.s32.totalorder %s2627_s22, %s2620_s26 }
  0x53   : > { %p2624_p1 = pneg %p2623_p13  ;;  %p2630_p3 = por %p2629_p0, %p2628_p11 }
  0x55   : > { %p2631_p9 = pnand %p2630_p3, %p2624_p1 }
  0x57   : > { %2634 = shalt.err (!%p2631_p9)
}
  0x58   : > { %s3315_s1 = smov 8   ;;  %s3316_s25 = smov 128  }
  0x59   : > { %2484 = dma.hbm_to_vmem [thread:$0]  (!%p2860_p6), %s2946_s7, 256, %s2955_s9, %s2959_s23, %s3316_s25, %s3316_s25, %s3315_s1  }
  0x5a   : > { %s2990_s0 = scalar_lea.hbm %s3274_s2, %s2858_s28  ;;  %s2635_s22 = scalar_lea.hbm %s3276_s4, 2048 }
  0x5b   : > { %p2636_p4 = scmp.ne.s32.totalorder %s3276_s4, %s2635_s22  ;;  %p3317_p1 = scmp.ne.s32.totalorder %s3314_s12, 0 }
  0x5c   : > { %p2642_p0 = scmp.lt.u32.totalorder %s2635_s22, %s3276_s4 }
  0x5d   : > { %p2637_p5 = pneg %p3317_p1 }
  0x5f   : > { %p2638_p7 = pnand %p2637_p5, %p2636_p4 }
  0x61   : > { %p2639_p11 = pneg %p2638_p7 }
  0x63   : > { %p2644_p2 = pnand %p2642_p0, %p2639_p11 }
  0x65   : > { %2647 = shalt.err (!%p2644_p2)
}
  0x66   : > { %s2648_s28 = scalar_lea.vmem %s2938_s24, 2048  ;;  %p2656_p3 = scmp.lt.s32.totalorder %s2938_s24, %s2938_s24 }
  0x67   : > { %p2649_p12 = scmp.ne.s32.totalorder %s2938_s24, %s2648_s28  ;;  %p2657_p9 = scmp.lt.s32.totalorder %s2648_s28, %s2648_s28 }
  0x69   : > { %p2651_p10 = pnand %p2649_p12, %p2637_p5  ;;  %p2658_p6 = por %p2657_p9, %p2656_p3 }
  0x6b   : > { %p2652_p13 = pneg %p2651_p10 }
  0x6d   : > { %p2659_p8 = pnand %p2658_p6, %p2652_p13 }
  0x6f   : > { %2662 = shalt.err (!%p2659_p8)
}
  0x70   : > { %2480 = dma.hbm_to_vmem [thread:$0]  (!%p3317_p1), %s3276_s4, 2048, %s2938_s24, [#allocation9], %s3316_s25, %s3316_s25, %s3315_s1  }
  0x71   : > { %s251_s21 = scalar_lea.vmem [#allocation7], %s2855_s27  ;;  %s2663_s10 = scalar_lea.hbm %s2990_s0, 256 }
  0x72   : > { %s258_s9 = sshll.u32 %s251_s21, 4  ;;  %p2664_p6 = scmp.ne.s32.totalorder %s2990_s0, %s2663_s10  ;;  %s3017_s9 = int_to_ptr.vmem [resolvable:$true] %s258_s9 }
  0x73   : > { %p3318_p8 = scmp.ne.s32.totalorder %s3306_s13, 0  ;;  %s2668_s23 = scalar_lea.hbm %s3274_s2, 512 }
  0x74   : > { %p2669_p7 = scmp.lt.u32.totalorder %s2990_s0, %s3274_s2  ;;  %p2670_p11 = scmp.lt.u32.totalorder %s2668_s23, %s2663_s10 }
  0x75   : > { %p2666_p4 = pnand %p2664_p6, %p3318_p8  ;;  %p2672_p1 = scmp.lt.u32.totalorder %s2663_s10, %s2990_s0 }
  0x76   : > { %p2671_p0 = por %p2670_p11, %p2669_p7 }
  0x77   : > { %p2667_p5 = pneg %p2666_p4 }
  0x78   : > { %p2673_p2 = por %p2672_p1, %p2671_p0 }
  0x7a   : > { %p2674_p12 = pnand %p2673_p2, %p2667_p5 }
  0x7c   : > { %2677 = shalt.err (!%p2674_p12)
}
  0x7d   : > { %s2678_s27 = scalar_lea.vmem %s3017_s9, 256  ;;  %s2774_s24 = smov [#allocation7]  }
  0x7e   : > { %p2679_p10 = scmp.ne.s32.totalorder %s3017_s9, %s2678_s27  ;;  %s2683_s26 = sshll.u32 %s2774_s24, 4  ;;  %s2684_s26 = int_to_ptr.vmem [resolvable:$false] %s2683_s26 }
  0x7f   : > { %s2685_s6 = scalar_lea.vmem %s2684_s26, 512  ;;  %p2686_p9 = scmp.lt.s32.totalorder %s3017_s9, %s2684_s26 }
  0x80   : > { %p2681_p13 = pnand %p2679_p10, %p3318_p8  ;;  %p2687_p6 = scmp.lt.s32.totalorder %s2685_s6, %s2678_s27 }
  0x82   : > { %p2682_p3 = pneg %p2681_p13  ;;  %p2688_p4 = por %p2687_p6, %p2686_p9 }
  0x84   : > { %p2689_p7 = pnand %p2688_p4, %p2682_p3 }
  0x86   : > { %2692 = shalt.err (!%p2689_p7)
}
  0x87   : > { %p3319_p5 = scmp.ne.s32.totalorder %s3304_s29, 0  ;;  %p3320_p8 = scmp.ne.s32.totalorder %s3312_s17, 0 }
  0x88   : > { %s3047_s13 = sand.u32 (!%p3320_p8), 1, %s2759_s19   ;;  %p3321_p11 = scmp.ne.s32.totalorder (!%p3320_p8), %s3307_s16, 0 }
  0x89   : > { %2490 = dma.hbm_to_vmem [thread:$0]  (!%p3319_p5), %s2990_s0, 256, %s3017_s9, %s2874_s11, %s3316_s25, %s3316_s25, %s3315_s1  }
  0x8a   : > { %270 = sbr.rel (%p3320_p8) target bundleno = 1598 (0x63e), region = 40  ;;  %s3050_s22 = sshll.u32 (!%p3320_p8), %s3047_s13, 4 }
  0x8b   : > { %s273_s29 = scalar_lea.sflag (!%p3320_p8), [#allocation3], %s3047_s13  ;;  %s276_s28 = scalar_lea.vmem (!%p3320_p8), [#allocation2], %s3050_s22 }
  0x91   : > { %2738 = dma.done.wait (%p3321_p11), %s273_s29, 256  }
  0x92   : > { %2740 = vsyncadd (%p3321_p11), %s273_s29, 4294967040  ;;  %s281_s0 = sand.u32 1, %s2908_s14   ;;  %s285_s17 = scalar_lea.vmem [#allocation5], %s3050_s22 }
  0x93   : > { %s282_s11 = scalar_lea.sflag [#allocation6], %s281_s0 }
  0x94   : > { %2742 = dma.done.wait (%p3321_p11), %s282_s11, 512  }
  0x95   : > { %2744 = vsyncadd (%p3321_p11), %s282_s11, 4294966784  ;;  %s294_s1 = scalar_lea.vmem [#allocation7], %s3050_s22  ;;  %p3322_p0 = scmp.eq.s32.totalorder %s2908_s14, 0 }
  0x97   : > { %2746 = dma.done.wait (%p3322_p0), [#allocation9], 2048   ;;  %p3323_p1 = pmov %p3322_p0 }
  0x98   : > { %v344_v0 = vld [vmem:[#allocation8 + $0x20] sm:$0xff]  ;;  %v345_v1 = vld [vmem:[#allocation8 + $0x28] sm:$0xff]  ;;  %vm364_vm0 = vcmask 261120   ;;  %v346_v5 = vld [vmem:[#allocation8 + $0x30] sm:$0xff]  ;;  %v2775_v16 = vmov 0.0   ;;  %vm2776_vm1 = vmmov 0  }
  0x99   : > { %2748 = vsyncadd (%p3323_p1), [#allocation9], 4294965248  ;;  %v339_v2 = vld [vmem:[#allocation8] sm:$0xff]  ;;  %v2441_v3 = vpack.c.bf16 %v345_v1, %v344_v0  ;;  %v340_v4 = vld [vmem:[#allocation8 + $0x8] sm:$0xff]  ;;  %vm657_vm2 = vcmask 64512   ;;  %s2777_s16 = smov 120  }
  0x9a   : > { %v347_v6 = vld [vmem:[#allocation8 + $0x38] sm:$0xff]  ;;  %v2433_v7 = vpack.c.bf16 %v340_v4, %v339_v2  ;;  %v341_v9 = vld [vmem:[#allocation8 + $0x10] sm:$0xff]  ;;  %v349_v17 = vld [vmem:[#allocation8 + $0x40] sm:$0xff]  ;;  %s2778_s25 = smov 112   ;;  %s2779_s18 = smov 104   ;;  %vm1964_vm3 = vcmask 130048  }
  0x9b   : > { %v2445_v8 = vpack.c.bf16 %v347_v6, %v346_v5  ;;  %v342_v10 = vld [vmem:[#allocation8 + $0x18] sm:$0xff]  ;;  %v360_v11 = vld [vmem:[%s285_s17] sm:$0xff]  ;;  %2442 = vmatprep.subr.bf16.mxu1 %v2441_v3  ;;  %v350_v18 = vld [vmem:[#allocation8 + $0x48] sm:$0xff]  ;;  %s2780_s9 = smov 8   ;;  %s2781_s10 = smov 16   ;;  %vm1967_vm4 = vcmask 195584  }
  0x9c   : > { %v2437_v12 = vpack.c.bf16 %v342_v10, %v341_v9  ;;  %2328 = vmatprep.mubr.msk.f32.mxu1 %vm364_vm0, %v360_v11  ;;  %v358_v13 = vld [vmem:[%s276_s28] sm:$0xff]  ;;  %2444 = vmatpush3.bf16.msra.mxu1 %v2441_v3  ;;  %v361_v14 = vld [vmem:[%s285_s17 + $0x8] sm:$0xff]  ;;  %v2449_v19 = vpack.c.bf16 %v350_v18, %v349_v17  ;;  %s2782_s12 = smov 24   ;;  %s334_s7 = scalar_lea.vmem [#allocation10], %s3050_s22 }
  0x9d   : > { %2434 = vmatprep.subr.bf16.mxu0 %v2433_v7  ;;  %2446 = vmatprep.subr.bf16.mxu1 %v2445_v8  ;;  %v359_v15 = vld [vmem:[%s276_s28 + $0x8] sm:$0xff]  ;;  %v351_v20 = vld [vmem:[#allocation8 + $0x50] sm:$0xff]  ;;  %v656_v44 = vld [vmem:[%s3275_s3] sm:$0xff]  ;;  %s2067_s23 = sshll.u32 %s334_s7, 4  ;;  %s2252_s15 = sshll.u32 %s2908_s14, 8  ;;  %s3220_s23 = int_to_ptr.vmem [resolvable:$true] %s2067_s23 }
  0x9e   : > { %2436 = vmatpush3.bf16.msra.mxu0 %v2433_v7  ;;  %2317 = vmatprep.mubr.msk.f32.mxu0 %vm364_vm0, %v358_v13  ;;  %v352_v21 = vld [vmem:[#allocation8 + $0x58] sm:$0xff]  ;;  %v362_v23 = vld [vmem:[%s294_s1] sm:$0xff]  ;;  %s3225_s24 = scalar_lea.hbm %s3277_s5, %s2252_s15  ;;  %s2054_s26 = scalar_lea.sflag [#allocation4], %s3047_s13 }
  0x9f   : > { %2438 = vmatprep.subr.bf16.mxu0 %v2437_v12  ;;  %v2453_v22 = vpack.c.bf16 %v352_v21, %v351_v20  ;;  %v363_v24 = vld [vmem:[%s294_s1 + $0x8] sm:$0xff]  ;;  %s2693_s6 = scalar_lea.vmem %s3220_s23, 256  ;;  %p3324_p12 = scmp.ne.s32.totalorder %s3309_s8, 0 }
  0xa0   : > { %2448 = vmatpush3.bf16.msra.mxu1 %v2445_v8  ;;  %p2694_p2 = scmp.ne.s32.totalorder %s3220_s23, %s2693_s6  ;;  %s2783_s14 = smov [#allocation10]  }
  0xa1   : > { %2342 = vmatprep.subr.mxu1 %v2775_v16  ;;  %s2697_s22 = sshll.u32 %s2783_s14, 4  ;;  %s2698_s22 = int_to_ptr.vmem [resolvable:$false] %s2697_s22 }
  0xa2   : > { %2440 = vmatpush3.bf16.msra.mxu0 %v2437_v12  ;;  %p2695_p10 = pnand %p2694_p2, %p3324_p12  ;;  %s2699_s29 = scalar_lea.vmem %s2698_s22, 512 }
  0xa3   : > { %2329 = vmatmul.mubr.msk.f32.vlgmr.msra.gmra.mrb[0].mxu1 %vm364_vm0, %v361_v14  ;;  %2450 = vmatprep.subr.bf16.mxu0 %v2449_v19  ;;  %p2700_p3 = scmp.lt.s32.totalorder %s3220_s23, %s2698_s22  ;;  %p2701_p9 = scmp.lt.s32.totalorder %s2699_s29, %s2693_s6 }
  0xa4   : > { %2344 = vmatprep.mubr.msk.f32.mxu1 %vm2776_vm1, %v2775_v16  ;;  %p2696_p13 = pneg %p2695_p10 }
  0xa5   : > { %2318 = vmatmul.mubr.msk.f32.vlgmr.msra.gmra.mrb[0].mxu0 %vm364_vm0, %v359_v15  ;;  %p2702_p6 = por %p2701_p9, %p2700_p3 }
  0xa6   : > { %2452 = vmatpush3.bf16.msra.mxu0 %v2449_v19  ;;  %2339 = vmatprep.mubr.msk.f32.mxu0 %vm364_vm0, %v362_v23 }
  0xa7   : > { %2454 = vmatprep.subr.bf16.mxu0 %v2453_v22  ;;  %p2703_p4 = pnand %p2702_p6, %p2696_p13 }
  0xaa   : > { %2456 = vmatpush3.bf16.msra.mxu0 %v2453_v22 }
  0xab   : > { %2362 = vmatprep.subr.mxu0 %v2775_v16 }
  0xad   : > { %2340 = vmatmul.mubr.msk.f32.vlgmr.msra.gmra.mrb[2].mxu0 %vm364_vm0, %v363_v24 }
  0xae   : > { %2364 = vmatprep.mubr.msk.f32.mxu0 %vm2776_vm1, %v2775_v16 }
 0x176   : > { %v2330_v25 = vpop.f32.mrb[0].mxu1 }
 0x177   : > { %626 = vrot.lane.b32.xlu1 %v2330_v25, %s2777_s16  ;;  %v518_v26 = vpop.f32.mrb[1].mxu1 }
 0x178   : > { %v2319_v27 = vpop.f32.mrb[0].mxu0  ;;  %624 = vrot.lane.b32.xlu0 %v518_v26, %s2777_s16  ;;  %2343 = vmatpush3.xpose.msk.msra.mxu1 %vm657_vm2, %v518_v26 }
 0x179   : > { %v437_v28 = vpop.f32.mrb[1].mxu0  ;;  %2347 = vmatprep.subr.mxu1 %v2775_v16 }
 0x17b   : > { %612 = vrot.lane.b32.xlu1 %v2319_v27, %s2777_s16  ;;  %2345 = vmatmul.mubr.msk.f32.vlgmr.msra.gmra.mrb[2].mxu1 %vm657_vm2, %v437_v28 }
 0x17c   : > { %610 = vrot.lane.b32.xlu0 %v437_v28, %s2777_s16  ;;  %2348 = vmatpush3.xpose.msk.msra.mxu1 %vm657_vm2, %v2330_v25 }
 0x17d   : > { %2349 = vmatprep.mubr.msk.f32.mxu1 %vm2776_vm1, %v2775_v16  ;;  %2352 = vmatprep.subr.mxu1 %v2775_v16 }
 0x17f   : > { %630 = vrot.lane.b32.xlu1 %v2330_v25, %s2778_s25  ;;  %2350 = vmatmul.mubr.msk.f32.vlgmr.msra.gmra.mrb[4].mxu1 %vm657_vm2, %v2319_v27 }
 0x180   : > { %628 = vrot.lane.b32.xlu0 %v518_v26, %s2778_s25  ;;  %2354 = vmatprep.mubr.msk.f32.mxu1 %vm2776_vm1, %v2775_v16  ;;  %v3141_v41 = vpop.f32.mrb[2].mxu0 }
 0x181   : > { %v3143_v42 = vpop.f32.mrb[3].mxu0 }
 0x183   : > { %616 = vrot.lane.b32.xlu1 %v2319_v27, %s2778_s25 }
 0x184   : > { %614 = vrot.lane.b32.xlu0 %v437_v28, %s2778_s25 }
 0x187   : > { %634 = vrot.lane.b32.xlu1 %v2330_v25, %s2779_s18 }
 0x188   : > { %632 = vrot.lane.b32.xlu0 %v518_v26, %s2779_s18 }
 0x18b   : > { %620 = vrot.lane.b32.xlu1 %v2319_v27, %s2779_s18 }
 0x18c   : > { %618 = vrot.lane.b32.xlu0 %v437_v28, %s2779_s18 }
 0x1e9   : > { %v627_v29 = vpop.permute.xlu1 %626 }
 0x1ea   : > { %v625_v30 = vpop.permute.xlu0 %624 }
 0x1eb   : > { %2353 = vmatpush3.xpose.msk.msra.mxu1 %vm657_vm2, %v625_v30 }
 0x1ec   : > { %2357 = vmatprep.subr.mxu1 %v2775_v16 }
 0x1ed   : > { %v613_v31 = vpop.permute.xlu1 %612 }
 0x1ee   : > { %v611_v32 = vpop.permute.xlu0 %610 }
 0x1ef   : > { %2355 = vmatmul.mubr.msk.f32.vlgmr.msra.gmra.mrb[6].mxu1 %vm657_vm2, %v611_v32 }
 0x1f0   : > { %2358 = vmatpush3.xpose.msk.msra.mxu1 %vm657_vm2, %v627_v29  ;;  %2359 = vmatprep.mubr.msk.f32.mxu1 %vm2776_vm1, %v2775_v16 }
 0x1f1   : > { %v631_v33 = vpop.permute.xlu1 %630  ;;  %2367 = vmatprep.subr.mxu1 %v2775_v16 }
 0x1f2   : > { %v629_v34 = vpop.permute.xlu0 %628 }
 0x1f3   : > { %2360 = vmatmul.mubr.msk.f32.vlgmr.msra.gmra.mrb[8].mxu1 %vm657_vm2, %v613_v31  ;;  %2363 = vmatpush3.xpose.msk.msra.mxu0 %vm657_vm2, %v629_v34 }
 0x1f4   : > { %2368 = vmatpush3.xpose.msk.msra.mxu1 %vm657_vm2, %v631_v33  ;;  %2369 = vmatprep.mubr.msk.f32.mxu1 %vm2776_vm1, %v2775_v16 }
 0x1f5   : > { %v617_v35 = vpop.permute.xlu1 %616  ;;  %2377 = vmatprep.subr.mxu1 %v2775_v16  ;;  %2372 = vmatprep.subr.mxu0 %v2775_v16 }
 0x1f6   : > { %v615_v36 = vpop.permute.xlu0 %614 }
 0x1f7   : > { %2365 = vmatmul.mubr.msk.f32.vlgmr.msra.gmra.mrb[4].mxu0 %vm657_vm2, %v615_v36  ;;  %2370 = vmatmul.mubr.msk.f32.vlgmr.msra.gmra.mrb[10].mxu1 %vm657_vm2, %v617_v35 }
 0x1f8   : > { %2379 = vmatprep.mubr.msk.f32.mxu1 %vm2776_vm1, %v2775_v16  ;;  %2374 = vmatprep.mubr.msk.f32.mxu0 %vm2776_vm1, %v2775_v16 }
 0x1f9   : > { %v635_v37 = vpop.permute.xlu1 %634 }
 0x1fa   : > { %v633_v38 = vpop.permute.xlu0 %632  ;;  %2378 = vmatpush3.xpose.msk.msra.mxu1 %vm657_vm2, %v635_v37 }
 0x1fb   : > { %2373 = vmatpush3.xpose.msk.msra.mxu0 %vm657_vm2, %v633_v38  ;;  %2387 = vmatprep.subr.mxu1 %v2775_v16 }
 0x1fc   : > { %2382 = vmatprep.subr.mxu0 %v2775_v16 }
 0x1fd   : > { %v621_v39 = vpop.permute.xlu1 %620 }
 0x1fe   : > { %v619_v40 = vpop.permute.xlu0 %618  ;;  %2380 = vmatmul.mubr.msk.f32.vlgmr.msra.gmra.mrb[12].mxu1 %vm657_vm2, %v621_v39 }
 0x1ff   : > { %2375 = vmatmul.mubr.msk.f32.vlgmr.msra.gmra.mrb[6].mxu0 %vm657_vm2, %v619_v40  ;;  %2389 = vmatprep.mubr.msk.f32.mxu1 %vm2776_vm1, %v2775_v16 }
 0x200   : > { %2384 = vmatprep.mubr.msk.f32.mxu0 %vm2776_vm1, %v2775_v16  ;;  %2388 = vmatpush3.msra.mxu1 %v3141_v41 }
 0x201   : > { %2383 = vmatpush3.msra.mxu0 %v3143_v42  ;;  %2397 = vmatprep.subr.mxu1 %v2775_v16 }
 0x202   : > { %2392 = vmatprep.subr.mxu0 %v2775_v16 }
 0x24e   : > { %v728_v43 = vpop.f32.mrb[2].mxu1 }
 0x24f   : > { %v1250_v45 = vmul.f32 0.35355338, %v728_v43  ;;  %v2346_v46 = vpop.f32.mrb[3].mxu1 }
 0x251   : > { %v1258_v47 = vadd.f32 %v1250_v45, %v656_v44 }
 0x252   : > { %v802_v48 = vpop.f32.mrb[4].mxu1 }
 0x253   : > { %v1251_v49 = vmul.f32 0.35355338, %v802_v48  ;;  %v2351_v50 = vpop.f32.mrb[5].mxu1  ;;  %v1266_v51 = vsel %vm657_vm2, %v1258_v47, -inf }
 0x254   : > { %1267 = vmax.xlane.f32.xlu0 %v1266_v51 }
 0x255   : > { %v1259_v52 = vadd.f32 %v1251_v49, %v656_v44 }
 0x257   : > { %v1269_v53 = vsel %vm657_vm2, %v1259_v52, -inf }
 0x258   : > { %1270 = vmax.xlane.f32.xlu1 %v1269_v53 }
 0x2c2   : > { %v876_v54 = vpop.f32.mrb[6].mxu1 }
 0x2c3   : > { %v1252_v55 = vmul.f32 0.35355338, %v876_v54  ;;  %v2356_v56 = vpop.f32.mrb[7].mxu1 }
 0x2c5   : > { %v1260_v57 = vadd.f32 %v1252_v55, %v656_v44 }
 0x2c6   : > { %v950_v58 = vpop.f32.mrb[8].mxu1 }
 0x2c7   : > { %v1253_v59 = vmul.f32 0.35355338, %v950_v58  ;;  %v2361_v60 = vpop.f32.mrb[9].mxu1  ;;  %v1272_v61 = vsel %vm657_vm2, %v1260_v57, -inf }
 0x2c8   : > { %1273 = vmax.xlane.f32.xlu0 %v1272_v61 }
 0x2c9   : > { %v1261_v62 = vadd.f32 %v1253_v59, %v656_v44 }
 0x2ca   : > { %v1024_v63 = vpop.f32.mrb[4].mxu0  ;;  %v1098_v0 = vpop.f32.mrb[10].mxu1 }
 0x2cb   : > { %v1254_v1 = vmul.f32 0.35355338, %v1024_v63  ;;  %v1255_v2 = vmul.f32 0.35355338, %v1098_v0  ;;  %v2366_v3 = vpop.f32.mrb[5].mxu0  ;;  %v2371_v4 = vpop.f32.mrb[11].mxu1 }
 0x2cc   : > { %v1275_v5 = vsel %vm657_vm2, %v1261_v62, -inf }
 0x2cd   : > { %1276 = vmax.xlane.f32.xlu0 %v1275_v5  ;;  %v1263_v6 = vadd.f32 %v1255_v2, %v656_v44  ;;  %v1262_v7 = vadd.f32 %v1254_v1, %v656_v44 }
 0x2cf   : > { %v1281_v8 = vsel %vm657_vm2, %v1263_v6, -inf  ;;  %v1278_v9 = vsel %vm657_vm2, %v1262_v7, -inf }
 0x2d0   : > { %1279 = vmax.xlane.f32.xlu1 %v1278_v9 }
 0x2d1   : > { %1282 = vmax.xlane.f32.xlu0 %v1281_v8  ;;  %v1246_v10 = vpop.f32.mrb[12].mxu1 }
 0x2d2   : > { %v1257_v11 = vmul.f32 0.35355338, %v1246_v10  ;;  %v1172_v12 = vpop.f32.mrb[6].mxu0  ;;  %v2381_v13 = vpop.f32.mrb[13].mxu1 }
 0x2d3   : > { %v1256_v14 = vmul.f32 0.35355338, %v1172_v12  ;;  %v2376_v15 = vpop.f32.mrb[7].mxu0 }
 0x2d4   : > { %v1265_v17 = vadd.f32 %v1257_v11, %v656_v44 }
 0x2d5   : > { %v1264_v18 = vadd.f32 %v1256_v14, %v656_v44 }
 0x2d6   : > { %v1287_v19 = vsel %vm657_vm2, %v1265_v17, -inf }
 0x2d7   : > { %1288 = vmax.xlane.f32.xlu0 %v1287_v19  ;;  %v1284_v20 = vsel %vm657_vm2, %v1264_v18, -inf }
 0x2d8   : > { %1285 = vmax.xlane.f32.xlu1 %v1284_v20 }
 0x2e1   : > { %v1268_v24 = vpop.xlane.xlu0 %1267 }
 0x2e2   : > { %v1290_v25 = vsub.f32 %v1258_v47, %v1268_v24 }
 0x2e4   : > { %v1298_v26 = vmul.f32 1.442695, %v1290_v25 }
 0x2e5   : > { %v1271_v21 = vpop.xlane.xlu1 %1270 }
 0x2e6   : > { %v1291_v22 = vsub.f32 %v1259_v52, %v1271_v21 }
 0x2e8   : > { %v1300_v23 = vmul.f32 1.442695, %v1291_v22 }
 0x2e9   : > { %638 = vrot.lane.b32.xlu1 %v3143_v42, %s2777_s16 }
 0x2ea   : > { %2543 = vpow2.f32 %v1300_v23 }
 0x2eb   : > { %2545 = vpow2.f32 %v1298_v26 }
 0x2ed   : > { %640 = vrot.lane.b32.xlu0 %v3141_v41, %s2777_s16  ;;  %644 = vrot.lane.b32.xlu1 %v3143_v42, %s2778_s25 }
 0x2f1   : > { %646 = vrot.lane.b32.xlu1 %v3141_v41, %s2778_s25 }
 0x2f4   : > { %v2544_v27 = vpop.eup %2543 }
 0x2f5   : > { %v1317_v28 = vsel %vm657_vm2, %v2544_v27, 0.0  ;;  %v2546_v29 = vpop.eup %2545 }
 0x2f6   : > { %v1314_v30 = vsel %vm657_vm2, %v2546_v29, 0.0 }
 0x30c   : > { %1318 = vadd.xlane.f32.xlu0 %v1317_v28 }
 0x315   : > { %1315 = vadd.xlane.f32.xlu1 %v1314_v30 }
 0x355   : > { %v1274_v31 = vpop.xlane.xlu0 %1273 }
 0x356   : > { %v1292_v32 = vsub.f32 %v1260_v57, %v1274_v31 }
 0x358   : > { %v1302_v33 = vmul.f32 1.442695, %v1292_v32  ;;  %v354_v32 = vld [vmem:[#allocation8 + $0x60] sm:$0xff] }
 0x35a   : > { %2547 = vpow2.f32 %v1302_v33  ;;  %v1277_v34 = vpop.xlane.xlu0 %1276  ;;  %v355_v33 = vld [vmem:[#allocation8 + $0x68] sm:$0xff] }
 0x35b   : > { %v1293_v35 = vsub.f32 %v1261_v62, %v1277_v34  ;;  %v356_v34 = vld [vmem:[#allocation8 + $0x70] sm:$0xff] }
 0x35d   : > { %v1304_v36 = vmul.f32 1.442695, %v1293_v35  ;;  %v1280_v37 = vpop.xlane.xlu1 %1279  ;;  %v2457_v35 = vpack.c.bf16 %v355_v33, %v354_v32 }
 0x35e   : > { %v1283_v38 = vpop.xlane.xlu0 %1282  ;;  %v1294_v39 = vsub.f32 %v1262_v7, %v1280_v37 }
 0x35f   : > { %2549 = vpow2.f32 %v1304_v36  ;;  %v1295_v40 = vsub.f32 %v1263_v6, %v1283_v38  ;;  %v357_v36 = vld [vmem:[#allocation8 + $0x78] sm:$0xff] }
 0x360   : > { %v1306_v43 = vmul.f32 1.442695, %v1294_v39 }
 0x361   : > { %v1308_v44 = vmul.f32 1.442695, %v1295_v40 }
 0x362   : > { %2551 = vpow2.f32 %v1306_v43 }
 0x363   : > { %2553 = vpow2.f32 %v1308_v44 }
 0x364   : > { %v2548_v45 = vpop.eup %2547  ;;  %v1289_v46 = vpop.xlane.xlu0 %1288 }
 0x365   : > { %v1297_v47 = vsub.f32 %v1265_v17, %v1289_v46  ;;  %v1286_v48 = vpop.xlane.xlu1 %1285  ;;  %v1320_v49 = vsel %vm657_vm2, %v2548_v45, 0.0 }
 0x366   : > { %v1296_v50 = vsub.f32 %v1264_v18, %v1286_v48  ;;  %1321 = vadd.xlane.f32.xlu1 %v1320_v49 }
 0x367   : > { %v1312_v51 = vmul.f32 1.442695, %v1297_v47 }
 0x368   : > { %v1310_v52 = vmul.f32 1.442695, %v1296_v50  ;;  %v641_v0 = vpop.permute.xlu0 %640 }
 0x369   : > { %v2550_v53 = vpop.eup %2549  ;;  %2555 = vpow2.f32 %v1312_v51  ;;  %v639_v63 = vpop.permute.xlu1 %638 }
 0x36a   : > { %2557 = vpow2.f32 %v1310_v52  ;;  %v1323_v54 = vsel %vm657_vm2, %v2550_v53, 0.0 }
 0x36b   : > { %1324 = vadd.xlane.f32.xlu0 %v1323_v54 }
 0x36c   : > { %v2552_v55 = vpop.eup %2551 }
 0x36d   : > { %v2554_v56 = vpop.eup %2553  ;;  %v1326_v57 = vsel %vm657_vm2, %v2552_v55, 0.0  ;;  %v645_v1 = vpop.permute.xlu1 %644 }
 0x36e   : > { %v1329_v58 = vsel %vm657_vm2, %v2554_v56, 0.0  ;;  %1327 = vadd.xlane.f32.xlu1 %v1326_v57 }
 0x36f   : > { %1330 = vadd.xlane.f32.xlu0 %v1329_v58 }
 0x371   : > { %v647_v3 = vpop.permute.xlu1 %646 }
 0x373   : > { %v3174_v59 = vpop.eup %2555 }
 0x374   : > { %v3176_v60 = vpop.eup %2557  ;;  %v1335_v61 = vsel %vm657_vm2, %v3174_v59, 0.0 }
 0x375   : > { %1336 = vadd.xlane.f32.xlu0 %v1335_v61  ;;  %v1332_v62 = vsel %vm657_vm2, %v3176_v60, 0.0 }
 0x376   : > { %1333 = vadd.xlane.f32.xlu1 %v1332_v62 }
 0x387   : > { %652 = vrot.lane.b32.xlu1 %v3141_v41, %s2779_s18 }
 0x38b   : > { %650 = vrot.lane.b32.xlu0 %v3143_v42, %s2779_s18 }
 0x399   : > { %v1319_v2 = vpop.xlane.xlu0 %1318 }
 0x39a   : > { %2559 = vrcp.f32 %v1319_v2 }
 0x3a2   : > { %v1316_v4 = vpop.xlane.xlu1 %1315 }
 0x3a3   : > { %2561 = vrcp.f32 %v1316_v4 }
 0x3a4   : > { %v2560_v5 = vpop.eup %2559 }
 0x3a5   : > { %v1347_v6 = vmul.f32 %v2560_v5, %v2544_v27 }
 0x3a7   : > { %2390 = vmatmul.mubr.msk.f32.vlgmr.msra.gmra.mrb[14].mxu1 %vm657_vm2, %v1347_v6 }
 0x3a8   : > { %2398 = vmatpush3.msra.mxu1 %v641_v0  ;;  %2399 = vmatprep.mubr.msk.f32.mxu1 %vm2776_vm1, %v2775_v16 }
 0x3a9   : > { %2407 = vmatprep.subr.mxu1 %v2775_v16 }
 0x3ad   : > { %v2562_v41 = vpop.eup %2561 }
 0x3ae   : > { %v1346_v42 = vmul.f32 %v2562_v41, %v2546_v29 }
 0x3b0   : > { %2385 = vmatmul.mubr.msk.f32.vlgmr.msra.gmra.mrb[8].mxu0 %vm657_vm2, %v1346_v42 }
 0x3b1   : > { %2393 = vmatpush3.msra.mxu0 %v639_v63  ;;  %2394 = vmatprep.mubr.msk.f32.mxu0 %vm2776_vm1, %v2775_v16 }
 0x3b2   : > { %2402 = vmatprep.subr.mxu0 %v2775_v16 }
 0x3f3   : > { %v1322_v7 = vpop.xlane.xlu1 %1321 }
 0x3f4   : > { %2563 = vrcp.f32 %v1322_v7 }
 0x3f8   : > { %v1325_v8 = vpop.xlane.xlu0 %1324 }
 0x3f9   : > { %2565 = vrcp.f32 %v1325_v8 }
 0x3fb   : > { %v1328_v9 = vpop.xlane.xlu1 %1327 }
 0x3fc   : > { %v1331_v10 = vpop.xlane.xlu0 %1330  ;;  %2567 = vrcp.f32 %v1328_v9 }
 0x3fd   : > { %2569 = vrcp.f32 %v1331_v10 }
 0x3fe   : > { %v2564_v11 = vpop.eup %2563 }
 0x3ff   : > { %v1348_v12 = vmul.f32 %v2564_v11, %v2548_v45 }
 0x401   : > { %2395 = vmatmul.mubr.msk.f32.vlgmr.msra.gmra.mrb[10].mxu0 %vm657_vm2, %v1348_v12 }
 0x402   : > { %2403 = vmatpush3.msra.mxu0 %v645_v1  ;;  %v1337_v13 = vpop.xlane.xlu0 %1336  ;;  %2404 = vmatprep.mubr.msk.f32.mxu0 %vm2776_vm1, %v2775_v16 }
 0x403   : > { %v2566_v14 = vpop.eup %2565  ;;  %2571 = vrcp.f32 %v1337_v13  ;;  %v1334_v15 = vpop.xlane.xlu1 %1333  ;;  %2412 = vmatprep.subr.mxu0 %v2775_v16 }
 0x404   : > { %v1349_v17 = vmul.f32 %v2566_v14, %v2550_v53  ;;  %2573 = vrcp.f32 %v1334_v15 }
 0x406   : > { %v2568_v18 = vpop.eup %2567  ;;  %2400 = vmatmul.mubr.msk.f32.vlgmr.msra.gmra.mrb[16].mxu1 %vm657_vm2, %v1349_v17  ;;  %v651_v23 = vpop.permute.xlu0 %650 }
 0x407   : > { %v2570_v19 = vpop.eup %2569  ;;  %v1350_v20 = vmul.f32 %v2568_v18, %v2552_v55  ;;  %2408 = vmatpush3.msra.mxu1 %v647_v3  ;;  %2409 = vmatprep.mubr.msk.f32.mxu1 %vm2776_vm1, %v2775_v16  ;;  %v653_v22 = vpop.permute.xlu1 %652 }
 0x408   : > { %v1351_v21 = vmul.f32 %v2570_v19, %v2554_v56  ;;  %2417 = vmatprep.subr.mxu1 %v2775_v16 }
 0x409   : > { %2405 = vmatmul.mubr.msk.f32.vlgmr.msra.gmra.mrb[12].mxu0 %vm657_vm2, %v1350_v20 }
 0x40a   : > { %2410 = vmatmul.mubr.msk.f32.vlgmr.msra.gmra.mrb[18].mxu1 %vm657_vm2, %v1351_v21  ;;  %2413 = vmatpush3.msra.mxu0 %v651_v23 }
 0x40b   : > { %2418 = vmatpush3.msra.mxu1 %v653_v22  ;;  %2419 = vmatprep.mubr.msk.f32.mxu1 %vm2776_vm1, %v2775_v16 }
 0x40c   : > { %2414 = vmatprep.mubr.msk.f32.mxu0 %vm2776_vm1, %v2775_v16  ;;  %v2461_v16 = vpack.c.bf16 %v357_v36, %v356_v34  ;;  %2458 = vmatprep.subr.bf16.mxu0 %v2457_v35 }
 0x40d   : > { %v2572_v24 = vpop.eup %2571 }
 0x40e   : > { %v2574_v25 = vpop.eup %2573  ;;  %v1353_v26 = vmul.f32 %v2572_v24, %v3174_v59 }
 0x40f   : > { %v1352_v27 = vmul.f32 %v2574_v25, %v3176_v60 }
 0x410   : > { %2420 = vmatmul.mubr.msk.f32.vlgmr.msra.gmra.mrb[20].mxu1 %vm657_vm2, %v1353_v26 }
 0x411   : > { %2415 = vmatmul.mubr.msk.f32.vlgmr.msra.gmra.mrb[14].mxu0 %vm657_vm2, %v1352_v27 }
 0x412   : > { %2460 = vmatpush3.bf16.msra.mxu0 %v2457_v35 }
 0x413   : > { %2462 = vmatprep.subr.bf16.mxu0 %v2461_v16 }
 0x416   : > { %2464 = vmatpush3.bf16.msra.mxu0 %v2461_v16 }
 0x47a   : > { %v1496_v28 = vpop.f32.mrb[14].mxu1 }
 0x47b   : > { %v2391_v29 = vpop.f32.mrb[15].mxu1 }
 0x483   : > { %v1423_v30 = vpop.f32.mrb[8].mxu0 }
 0x484   : > { %v2386_v31 = vpop.f32.mrb[9].mxu0 }
 0x4d4   : > { %v1569_v37 = vpop.f32.mrb[10].mxu0 }
 0x4d5   : > { %1940 = vrot.lane.b32.xlu0 %v1569_v37, %s2780_s9  ;;  %v2396_v38 = vpop.f32.mrb[11].mxu0 }
 0x4d9   : > { %v1642_v39 = vpop.f32.mrb[16].mxu1 }
 0x4da   : > { %v2401_v40 = vpop.f32.mrb[17].mxu1  ;;  %1942 = vrot.lane.b32.xlu1 %v1642_v39, %s2780_s9 }
 0x4dc   : > { %v1715_v43 = vpop.f32.mrb[12].mxu0 }
 0x4dd   : > { %v1788_v44 = vpop.f32.mrb[18].mxu1  ;;  %1948 = vrot.lane.b32.xlu0 %v1715_v43, %s2781_s10  ;;  %v2406_v45 = vpop.f32.mrb[13].mxu0 }
 0x4de   : > { %1950 = vrot.lane.b32.xlu1 %v1788_v44, %s2781_s10  ;;  %v2411_v46 = vpop.f32.mrb[19].mxu1 }
 0x4e3   : > { %v1934_v47 = vpop.f32.mrb[20].mxu1 }
 0x4e4   : > { %1958 = vrot.lane.b32.xlu1 %v1934_v47, %s2782_s12  ;;  %v1861_v48 = vpop.f32.mrb[14].mxu0  ;;  %v2421_v49 = vpop.f32.mrb[21].mxu1 }
 0x4e5   : > { %1956 = vrot.lane.b32.xlu0 %v1861_v48, %s2782_s12  ;;  %v2416_v50 = vpop.f32.mrb[15].mxu0 }
 0x547   : > { %v1941_v52 = vpop.permute.xlu0 %1940 }
 0x548   : > { %v1962_v55 = vsel %vm657_vm2, %v1423_v30, %v1941_v52 }
 0x54c   : > { %v1943_v51 = vpop.permute.xlu1 %1942 }
 0x54d   : > { %v1963_v57 = vsel %vm657_vm2, %v1496_v28, %v1943_v51 }
 0x54f   : > { %v1949_v54 = vpop.permute.xlu0 %1948 }
 0x550   : > { %v1951_v53 = vpop.permute.xlu1 %1950  ;;  %v1965_v58 = vsel %vm1964_vm3, %v1962_v55, %v1949_v54 }
 0x551   : > { %v1966_v60 = vsel %vm1964_vm3, %v1963_v57, %v1951_v53 }
 0x556   : > { %v1959_v56 = vpop.permute.xlu1 %1958 }
 0x557   : > { %v1957_v59 = vpop.permute.xlu0 %1956  ;;  %v1969_v62 = vsel %vm1967_vm4, %v1966_v60, %v1959_v56 }
 0x558   : > { %v1968_v61 = vsel %vm1967_vm4, %v1965_v58, %v1957_v59 }
 0x559   : > { %2430 = vmatprep.mubr.msk.f32.mxu0 %vm364_vm0, %v1968_v61 }
 0x55a   : > { %2431 = vmatmul.mubr.msk.f32.vlgmr.msra.gmra.mrb[16].mxu0 %vm364_vm0, %v1969_v62 }
 0x62d   : > { %v2432_v63 = vpop.f32.mrb[16].mxu0 }
 0x62e   : > { %2052 = vst.msk [vmem:[%s334_s7 + $0x8] sm:$0xff] %vm364_vm0, %v2432_v63  ;;  %v2042_v0 = vpop.f32.mrb[17].mxu0 }
 0x62f   : > { %2051 = vst.msk [vmem:[%s334_s7] sm:$0xff] %vm364_vm0, %v2042_v0 }
 0x630   : > { %2706 = shalt.err (!%p2703_p4)
}
 0x631   : > { %s2707_s28 = scalar_lea.hbm %s3225_s24, 256  ;;  %s2711_s17 = scalar_lea.hbm %s3277_s5, 512 }
 0x632   : > { %p2708_p7 = scmp.ne.s32.totalorder %s3225_s24, %s2707_s28  ;;  %p2712_p11 = scmp.lt.u32.totalorder %s3225_s24, %s3277_s5 }
 0x633   : > { %p2713_p0 = scmp.lt.u32.totalorder %s2711_s17, %s2707_s28  ;;  %p2715_p2 = scmp.lt.u32.totalorder %s2707_s28, %s3225_s24 }
 0x634   : > { %p2709_p5 = pnand %p2708_p7, %p3324_p12 }
 0x635   : > { %p2714_p1 = por %p2713_p0, %p2712_p11 }
 0x636   : > { %p2710_p8 = pneg %p2709_p5 }
 0x637   : > { %p2716_p10 = por %p2715_p2, %p2714_p1 }
 0x639   : > { %p2717_p13 = pnand %p2716_p10, %p2710_p8 }
 0x63b   : > { %2720 = shalt.err (!%p2717_p13)
}
 0x63c   : > { %s2784_s25 = smov 128  }
 0x63d   : > { %2475 = dma.vmem_to_hbm [thread:$0]  (%p3324_p12), %s3220_s23, 256, %s3225_s24, %s2054_s26, %s2784_s25, %s2784_s25, %s2780_s9  }
 0x63e PF: > { %s3325_s18 = sld [smem:[#allocation15_spill]]  ;;  %s3326_s20 = sld [smem:[#allocation20_spill]] }
 0x63f   : > { %s3327_s21 = sld [smem:[#allocation17_spill]] }
 0x644   : > { %s2082_s10 = sand.u32 1, %s3325_s18   ;;  %p3328_p3 = scmp.ne.s32.totalorder %s3326_s20, 0 }
 0x645   : > { %p3329_p9 = scmp.ge.s32.totalorder %s3327_s21, 2  ;;  %s2083_s12 = scalar_lea.sflag [#allocation4], %s2082_s10 }
 0x647   : > { %p2492_p6 = pnand %p3329_p9, %p3328_p3 }
 0x649   : > { %2750 = dma.done.wait (!%p2492_p6), %s2083_s12, 256  }
 0x64a   : > { %2752 = vsyncadd (!%p2492_p6), %s2083_s12, 4294967040  ;;  %s3330_s21 = sld [smem:[#allocation18_spill]]  ;;  %s3331_s8 = sld [smem:[#allocation16_spill]] }
 0x64b   : > { %s3332_s20 = sld [smem:[#allocation19_spill]]  ;;  %s3333_s18 = smov %s2759_s19 }
 0x650   : > { %p22_p4 = scmp.ge.s32.totalorder %s3330_s21, 4   ;;  %s3334_s19 = smov %s3331_s8 }
 0x652   :  { %24 = sbr.rel (!%p22_p4) target bundleno = 11 (0xb), region = 116 }
 0x659   :  { %2088 = vsyncpa [#allocation3], 1 }
 0x65a   :  { %2090 = vsyncpa [#allocation3 + $0x1], 1 }
 0x65b   :  { %2091 = vsyncpa [#allocation6], 1 }
 0x65c   :  { %2093 = vsyncpa [#allocation6 + $0x1], 1 }
 0x65d   :  { %2094 = vsyncpa [#allocation9], 1 }
 0x65e   :  { %2095 = vsyncpa [#allocation4], 1 }
 0x65f   :  { %2097 = vsyncpa [#allocation4 + $0x1], 1 }

</bundles_post_ra>
